<compile_context>
chip_gen: v7x
topology: tpu7x:2x2x1
jax: 0.10.0
libtpu: 0.0.40
codegen_flags: <defaults>
</compile_context>

<pallas_src>
import functools

import jax
import jax.numpy as jnp
from jax import lax
from jax.experimental import pallas as pl
from jax.experimental.pallas import tpu as pltpu


# ----------------------------- in-kernel helpers ---------------------------------

def _layernorm(x, gamma, beta, eps=1e-5):
    # x: (rows, C) f32, gamma/beta: (1, C) f32
    mean = jnp.mean(x, axis=-1, keepdims=True)
    var = jnp.mean((x - mean) ** 2, axis=-1, keepdims=True)
    return (x - mean) * lax.rsqrt(var + eps) * gamma + beta


_SQRT_2_OVER_PI = 0.7978845608028654


def _gelu_tanh(x):
    # tanh-approx GELU: one EUP tanh + a few VALU ops (within the stated 2e-3 tolerance).
    return 0.5 * x * (1.0 + jnp.tanh(_SQRT_2_OVER_PI * (x + 0.044715 * x * x * x)))


# ----------------------------------- kernel --------------------------------------

def _block_dyvit_kernel(num_heads, tq, n_valid, use_policy, *refs):
    if use_policy:
        (pol_ref, xt_ref, xf_ref,
         g1_ref, b1_ref, wq_ref, wk_ref, wv_ref, wproj_ref, bproj_ref,
         g2_ref, b2_ref, w1_ref, bfc1_ref, w2_ref, bfc2_ref,
         out_ref, xn_scr, k_scr, v_scr) = refs
    else:
        (xt_ref, xf_ref,
         g1_ref, b1_ref, wq_ref, wk_ref, wv_ref, wproj_ref, bproj_ref,
         g2_ref, b2_ref, w1_ref, bfc1_ref, w2_ref, bfc2_ref,
         out_ref, xn_scr, k_scr, v_scr) = refs
        pol_ref = None

    qt = pl.program_id(1)
    n_pad = xf_ref.shape[1]
    C = xf_ref.shape[2]
    hd = C // num_heads

    g1 = g1_ref[...]
    b1 = b1_ref[...]

    # ---- once per batch element: LN(x) for the full sequence + head-major K / V ----
    @pl.when(qt == 0)
    def _():
        xn_full = _layernorm(xf_ref[0], g1, b1).astype(jnp.bfloat16)            # (n_pad, C)
        xn_scr[...] = xn_full
        k_full = jnp.dot(xn_full, wk_ref[...],
                         preferred_element_type=jnp.float32).astype(jnp.bfloat16)
        v_full = jnp.dot(xn_full, wv_ref[...],
                         preferred_element_type=jnp.float32).astype(jnp.bfloat16)
        # pay the per-head lane slice once per batch element; later reads are leading-index.
        for h in range(num_heads):
            sl = slice(h * hd, (h + 1) * hd)
            k_scr[h] = k_full[:, sl]
            v_scr[h] = v_full[:, sl]

    row0 = pl.multiple_of(qt * tq, tq)
    x_tile = xt_ref[0]                                                           # (tq, C) f32, raw
    xn_tile = xn_scr[pl.ds(row0, tq), :]                                         # (tq, C) bf16
    # softmax scale is folded into wq in the wrapper.
    q_tile = jnp.dot(xn_tile, wq_ref[...],
                     preferred_element_type=jnp.float32).astype(jnp.bfloat16)    # (tq, C)

    # ---- per-tile constants, hoisted out of the head loop ----
    pad_cols = n_pad > n_valid                                                   # static
    if pad_cols:
        col = lax.broadcasted_iota(jnp.int32, (1, n_pad), 1)
        key_bias = jnp.where(col < n_valid, 0.0, -1e30).astype(jnp.float32)      # (1, n_pad)
    if use_policy:
        pol = pol_ref[0]                                                         # (1, n_pad)
        rows = row0 + lax.broadcasted_iota(jnp.int32, (tq, n_pad), 0)
        cols = lax.broadcasted_iota(jnp.int32, (tq, n_pad), 1)
        factor = jnp.where(rows == cols, jnp.float32(1.0), pol)                  # (tq, n_pad)
        eps_over_n = 1e-6 / n_valid

    # projection accumulator starts at the projection bias (lane-dense (tq, C) f32)
    proj_acc = jnp.broadcast_to(bproj_ref[...], (tq, C)).astype(jnp.float32)

    for h in range(num_heads):
        sl = slice(h * hd, (h + 1) * hd)
        qh = q_tile[:, sl]                                                       # (tq, hd) bf16
        kh = k_scr[h]                                                            # (n_pad, hd) bf16
        vh = v_scr[h]
        s = lax.dot_general(qh, kh, (((1,), (1,)), ((), ())),
                            preferred_element_type=jnp.float32)                  # (tq, n_pad) f32
        if pad_cols:
            s = s + key_bias
        m = jnp.max(s, axis=-1, keepdims=True)
        e = jnp.exp(s - m)
        if use_policy:
            e = e * factor
            num = e + eps_over_n
            inv = pl.reciprocal(jnp.sum(e, axis=-1, keepdims=True) + 1e-6, approx=True)
        else:
            num = e
            inv = pl.reciprocal(jnp.sum(e, axis=-1, keepdims=True), approx=True)
        p = (num * inv).astype(jnp.bfloat16)
        o_h = jnp.dot(p, vh, preferred_element_type=jnp.float32)                 # (tq, hd) f32
        # fold this head's output straight into the projection (no masked hd-wide stores)
        proj_acc = proj_acc + jnp.dot(o_h.astype(jnp.bfloat16), wproj_ref[h],
                                      preferred_element_type=jnp.float32)

    x1 = x_tile + proj_acc                                                       # residual 1

    # ------------------------- MLP branch -------------------------
    xn2 = _layernorm(x1, g2_ref[...], b2_ref[...])
    h1 = jnp.dot(xn2.astype(jnp.bfloat16), w1_ref[...],
                 preferred_element_type=jnp.float32) + bfc1_ref[...]
    h1 = _gelu_tanh(h1)
    h2 = jnp.dot(h1.astype(jnp.bfloat16), w2_ref[...],
                 preferred_element_type=jnp.float32) + bfc2_ref[...]

    out_ref[0] = x1 + h2                                                         # residual 2


# ----------------------------------- wrapper --------------------------------------

def block_dyvit(x, policy, params, num_heads, q_tile=256):
    """x: (B, N, C) f32; policy: (B, N, 1) f32 or None. Returns (B, N, C) f32."""
    B, N, C = x.shape
    assert C % num_heads == 0
    hd = C // num_heads
    scale = hd ** -0.5
    use_policy = policy is not None

    def rup(v, m):
        return ((v + m - 1) // m) * m

    # query tile: multiple of 16 (keeps bf16 xn-scratch row slices tile-aligned); pad N up to it.
    tq = rup(max(16, min(q_tile, rup(N, 16))), 16)
    n_pad = rup(N, tq)
    n_qt = n_pad // tq

    x_f32 = x.astype(jnp.float32)
    if n_pad != N:
        x_f32 = jnp.pad(x_f32, ((0, 0), (0, n_pad - N), (0, 0)))

    def row(v):                                             # (1, dim), lane-major, f32
        return v.reshape(1, -1).astype(jnp.float32)

    # split qkv; fold softmax scale into wq; pre-cast MXU weights to bf16; head-major wproj.
    wqkv = params["wqkv"]
    wq = (wqkv[:, :C] * scale).astype(jnp.bfloat16)
    wk = wqkv[:, C:2 * C].astype(jnp.bfloat16)
    wv = wqkv[:, 2 * C:].astype(jnp.bfloat16)
    wproj = params["wproj"].reshape(num_heads, hd, C).astype(jnp.bfloat16)
    w1 = params["w1"].astype(jnp.bfloat16)
    w2 = params["w2"].astype(jnp.bfloat16)
    g1r, b1r = row(params["g1"]), row(params["b1"])
    g2r, b2r = row(params["g2"]), row(params["b2"])
    bprojr = row(params["bproj"])
    bfc1r, bfc2r = row(params["bfc1"]), row(params["bfc2"])

    def const_spec(a):
        index_map = lambda b, t: (0,) * a.ndim
        try:   # constant-index operands: single buffer (double-buffering buys nothing here)
            return pl.BlockSpec(a.shape, index_map, pipeline_mode=pl.Buffered(1))
        except (TypeError, AttributeError):
            # TODO(synk): pipeline_mode unsupported on this jax version; default double-buffering.
            return pl.BlockSpec(a.shape, index_map)

    consts = (g1r, b1r, wq, wk, wv, wproj, bprojr, g2r, b2r, w1, bfc1r, w2, bfc2r)
    const_specs = [const_spec(a) for a in consts]

    inputs = []
    in_specs = []
    if use_policy:
        pol_in = policy.reshape(B, 1, N).astype(jnp.float32)
        if n_pad != N:
            pol_in = jnp.pad(pol_in, ((0, 0), (0, 0), (0, n_pad - N)))   # padded keys -> policy 0
        inputs.append(pol_in)
        in_specs.append(pl.BlockSpec((1, 1, n_pad), lambda b, t: (b, 0, 0)))
    inputs += [x_f32, x_f32, *consts]
    in_specs += [
        pl.BlockSpec((1, tq, C), lambda b, t: (b, t, 0)),        # x query tile (residual path)
        pl.BlockSpec((1, n_pad, C), lambda b, t: (b, 0, 0)),     # x full sequence (K/V at qt==0)
        *const_specs,
    ]

    # VMEM budget: single-buffered constants + double-buffered streaming blocks + scratch, plus
    # headroom for per-tile temporaries / compiler scratch (don't grab all of v7x's 64 MiB).
    est = sum(int(a.size) * a.dtype.itemsize for a in consts)
    est += 2 * (tq * C * 4) * 2                                  # x tile in + out tile (2 buffers)
    est += 2 * (n_pad * C * 4)                                   # x full block (2 buffers)
    if use_policy:
        est += 2 * (n_pad * 4)
    est += n_pad * C * 2 + 2 * num_heads * n_pad * hd * 2        # xn + head-major K/V scratch
    vmem_limit = int(max(32 << 20, min(est + (16 << 20), 100 << 20)))

    kernel = functools.partial(_block_dyvit_kernel, num_heads, tq, N, use_policy)

    out = pl.pallas_call(
        kernel,
        out_shape=jax.ShapeDtypeStruct((B, n_pad, C), jnp.float32),
        grid_spec=pltpu.PrefetchScalarGridSpec(
            num_scalar_prefetch=0,
            grid=(B, n_qt),
            in_specs=in_specs,
            out_specs=pl.BlockSpec((1, tq, C), lambda b, t: (b, t, 0)),
            scratch_shapes=[
                pltpu.VMEM((n_pad, C), jnp.bfloat16),                  # LayerNorm'd sequence
                pltpu.VMEM((num_heads, n_pad, hd), jnp.bfloat16),      # K, head-major
                pltpu.VMEM((num_heads, n_pad, hd), jnp.bfloat16),      # V, head-major
            ],
        ),
        # TODO(synk): for B=1 inference on v7x, hoist the K/V projection into its own call so the
        # query-tile axis can be marked "parallel" and use both TensorCores.
        compiler_params=pltpu.CompilerParams(
            dimension_semantics=("parallel", "arbitrary"),
            vmem_limit_bytes=vmem_limit,
        ),
    )(*inputs)

    return out[:, :N, :] if n_pad != N else out


# ------------------------------ pure-JAX reference ---------------------------------

def block_dyvit_ref(x, policy, params, num_heads):
    B, N, C = x.shape
    hd = C // num_heads
    scale = hd ** -0.5
    hp = lax.Precision.HIGHEST

    def ln(t, g, b):
        mu = jnp.mean(t, axis=-1, keepdims=True)
        var = jnp.mean((t - mu) ** 2, axis=-1, keepdims=True)
        return (t - mu) / jnp.sqrt(var + 1e-5) * g + b

    xn = ln(x, params["g1"], params["b1"])
    qkv = jnp.einsum("bnc,cd->bnd", xn, params["wqkv"], precision=hp)
    qkv = qkv.reshape(B, N, 3, num_heads, hd).transpose(2, 0, 3, 1, 4)
    q, k, v = qkv[0], qkv[1], qkv[2]
    attn = jnp.einsum("bhnd,bhmd->bhnm", q, k, precision=hp) * scale
    if policy is None:
        attn = jax.nn.softmax(attn, axis=-1)
    else:
        pol = policy.reshape(B, 1, 1, N)
        eye = jnp.eye(N, dtype=jnp.float32).reshape(1, 1, N, N)
        attn_policy = pol + (1.0 - pol) * eye
        m = jnp.max(attn, axis=-1, keepdims=True)
        e = jnp.exp(attn - m) * attn_policy
        attn = (e + 1e-6 / N) / (jnp.sum(e, axis=-1, keepdims=True) + 1e-6)
    o = jnp.einsum("bhnm,bhmd->bhnd", attn, v, precision=hp)
    o = o.transpose(0, 2, 1, 3).reshape(B, N, C)
    o = jnp.einsum("bnc,cd->bnd", o, params["wproj"], precision=hp) + params["bproj"]
    x1 = x + o
    xn2 = ln(x1, params["g2"], params["b2"])
    h = jnp.einsum("bnc,ch->bnh", xn2, params["w1"], precision=hp) + params["bfc1"]
    h = jax.nn.gelu(h, approximate=False)
    h = jnp.einsum("bnh,hc->bnc", h, params["w2"], precision=hp) + params["bfc2"]
    return x1 + h


# ----------------------------------- main -----------------------------------------

if __name__ == "__main__":
    num_heads = 4
    mlp_ratio = 4.0
    C = 32
    hidden = int(C * mlp_ratio)

    key = jax.random.PRNGKey(0)
    ks = jax.random.split(key, 8)

    params = {
        "g1": jnp.ones((C,), jnp.float32),
        "b1": jnp.zeros((C,), jnp.float32),
        # weights stored pre-transposed (in_features, out_features) for y = x @ W
        "wqkv": 0.02 * jax.random.normal(ks[0], (C, 3 * C), jnp.float32),
        "wproj": 0.02 * jax.random.normal(ks[1], (C, C), jnp.float32),
        "bproj": jnp.zeros((C,), jnp.float32),
        "g2": jnp.ones((C,), jnp.float32),
        "b2": jnp.zeros((C,), jnp.float32),
        "w1": 0.02 * jax.random.normal(ks[2], (C, hidden), jnp.float32),
        "bfc1": jnp.zeros((hidden,), jnp.float32),
        "w2": 0.02 * jax.random.normal(ks[3], (hidden, C), jnp.float32),
        "bfc2": jnp.zeros((C,), jnp.float32),
    }

    # bf16 MXU inputs + approx reciprocal + tanh-GELU vs the f32 HIGHEST / exact-GELU reference
    # -> slightly relaxed tolerance.
    atol = rtol = 2e-3

    def check(name, x, policy, q_tile):
        out = jax.block_until_ready(block_dyvit(x, policy, params, num_heads, q_tile=q_tile))
        ref = block_dyvit_ref(x, policy, params, num_heads)
        assert out.shape == x.shape and out.dtype == jnp.float32
        err = float(jnp.max(jnp.abs(out - ref)))
        assert jnp.allclose(out, ref, atol=atol, rtol=rtol), f"{name}: max abs err {err}"

    # B=2, N=8 (padded to 16 internally): with & without DyViT keep/drop policy.
    x8 = jax.random.normal(ks[4], (2, 8, C), jnp.float32)
    pol8 = (jax.random.uniform(ks[5], (2, 8, 1)) > 0.3).astype(jnp.float32)
    pol8 = pol8.at[:, 0, :].set(1.0)                    # cls token always kept
    check("policy N=8", x8, pol8, 256)
    check("no-policy N=8", x8, None, 256)

    # non-divisible N=20 with q_tile=16 -> 2 query tiles + key-column padding/masking path.
    x20 = jax.random.normal(ks[6], (2, 20, C), jnp.float32)
    pol20 = (jax.random.uniform(ks[7], (2, 20, 1)) > 0.3).astype(jnp.float32)
    pol20 = pol20.at[:, 0, :].set(1.0)
    check("policy N=20 tiled", x20, pol20, 16)
    check("no-policy N=20 tiled", x20, None, 16)

    print("KERNEL_OK")
</pallas_src>

<mosaic_0001>
module attributes {stable_mosaic.version = 11 : i64} {
  func.func @_block_dyvit_kernel(%arg0: i32, %arg1: i32, %arg2: memref<1x1x16xf32, #tpu.memory_space<vmem>>, %arg3: memref<1x16x32xf32, #tpu.memory_space<vmem>>, %arg4: memref<1x16x32xf32, #tpu.memory_space<vmem>>, %arg5: memref<1x32xf32, #tpu.memory_space<vmem>>, %arg6: memref<1x32xf32, #tpu.memory_space<vmem>>, %arg7: memref<32x32xbf16, #tpu.memory_space<vmem>>, %arg8: memref<32x32xbf16, #tpu.memory_space<vmem>>, %arg9: memref<32x32xbf16, #tpu.memory_space<vmem>>, %arg10: memref<4x8x32xbf16, #tpu.memory_space<vmem>>, %arg11: memref<1x32xf32, #tpu.memory_space<vmem>>, %arg12: memref<1x32xf32, #tpu.memory_space<vmem>>, %arg13: memref<1x32xf32, #tpu.memory_space<vmem>>, %arg14: memref<32x128xbf16, #tpu.memory_space<vmem>>, %arg15: memref<1x128xf32, #tpu.memory_space<vmem>>, %arg16: memref<128x32xbf16, #tpu.memory_space<vmem>>, %arg17: memref<1x32xf32, #tpu.memory_space<vmem>>, %arg18: memref<1x16x32xf32, #tpu.memory_space<vmem>>, %arg19: memref<16x32xbf16, #tpu.memory_space<vmem>>, %arg20: memref<4x16x8xbf16, #tpu.memory_space<vmem>>, %arg21: memref<4x16x8xbf16, #tpu.memory_space<vmem>>) attributes {dimension_semantics = [#tpu.dimension_semantics<parallel>, #tpu.dimension_semantics<arbitrary>], iteration_bounds = array<i64: 2, 1>, scalar_prefetch = 0 : i64, scratch_operands = 3 : i64, tpu.core_type = #tpu.core_type<tc>, window_params = [{transform_indices = @transform_0, window_bounds = array<i64: 1, 1, 16>}, {transform_indices = @transform_1, window_bounds = array<i64: 1, 16, 32>}, {transform_indices = @transform_2, window_bounds = array<i64: 1, 16, 32>}, {pipeline_mode = #tpu.pipeline_mode<synchronous>, transform_indices = @transform_3, window_bounds = array<i64: 1, 32>}, {pipeline_mode = #tpu.pipeline_mode<synchronous>, transform_indices = @transform_4, window_bounds = array<i64: 1, 32>}, {pipeline_mode = #tpu.pipeline_mode<synchronous>, transform_indices = @transform_5, window_bounds = array<i64: 32, 32>}, {pipeline_mode = #tpu.pipeline_mode<synchronous>, transform_indices = @transform_6, window_bounds = array<i64: 32, 32>}, {pipeline_mode = #tpu.pipeline_mode<synchronous>, transform_indices = @transform_7, window_bounds = array<i64: 32, 32>}, {pipeline_mode = #tpu.pipeline_mode<synchronous>, transform_indices = @transform_8, window_bounds = array<i64: 4, 8, 32>}, {pipeline_mode = #tpu.pipeline_mode<synchronous>, transform_indices = @transform_9, window_bounds = array<i64: 1, 32>}, {pipeline_mode = #tpu.pipeline_mode<synchronous>, transform_indices = @transform_10, window_bounds = array<i64: 1, 32>}, {pipeline_mode = #tpu.pipeline_mode<synchronous>, transform_indices = @transform_11, window_bounds = array<i64: 1, 32>}, {pipeline_mode = #tpu.pipeline_mode<synchronous>, transform_indices = @transform_12, window_bounds = array<i64: 32, 128>}, {pipeline_mode = #tpu.pipeline_mode<synchronous>, transform_indices = @transform_13, window_bounds = array<i64: 1, 128>}, {pipeline_mode = #tpu.pipeline_mode<synchronous>, transform_indices = @transform_14, window_bounds = array<i64: 128, 32>}, {pipeline_mode = #tpu.pipeline_mode<synchronous>, transform_indices = @transform_15, window_bounds = array<i64: 1, 32>}, {transform_indices = @transform_16, window_bounds = array<i64: 1, 16, 32>}]} {
    %c0 = arith.constant 0 : index
    %c0_0 = arith.constant 0 : index
    %0 = vector.load %arg5[%c0, %c0_0] : memref<1x32xf32, #tpu.memory_space<vmem>>, vector<1x32xf32>
    %c0_1 = arith.constant 0 : index
    %c0_2 = arith.constant 0 : index
    %1 = vector.load %arg6[%c0_1, %c0_2] : memref<1x32xf32, #tpu.memory_space<vmem>>, vector<1x32xf32>
    %c0_i32 = arith.constant 0 : i32
    %2 = arith.cmpi eq, %arg1, %c0_i32 : i32
    %3 = arith.extui %2 : i1 to i32
    %c0_i32_3 = arith.constant 0 : i32
    %4 = arith.cmpi ne, %3, %c0_i32_3 : i32
    scf.if %4 {
      %c0_105 = arith.constant 0 : index
      %c0_106 = arith.constant 0 : index
      %c0_107 = arith.constant 0 : index
      %208 = vector.load %arg4[%c0_105, %c0_106, %c0_107] : memref<1x16x32xf32, #tpu.memory_space<vmem>>, vector<1x16x32xf32>
      %209 = vector.shape_cast %208 : vector<1x16x32xf32> to vector<16x32xf32>
      %cst_108 = arith.constant dense<0.000000e+00> : vector<16xf32>
      %210 = vector.multi_reduction <add>, %209, %cst_108 [1] : vector<16x32xf32> to vector<16xf32>
      %211 = vector.shape_cast %210 : vector<16xf32> to vector<16x1xf32>
      %cst_109 = arith.constant 3.200000e+01 : f32
      %212 = vector.broadcast %cst_109 : f32 to vector<16x1xf32>
      %213 = arith.divf %211, %212 : vector<16x1xf32>
      %214 = vector.broadcast %213 : vector<16x1xf32> to vector<16x32xf32>
      %215 = arith.subf %209, %214 : vector<16x32xf32>
      %216 = arith.mulf %215, %215 : vector<16x32xf32>
      %cst_110 = arith.constant dense<0.000000e+00> : vector<16xf32>
      %217 = vector.multi_reduction <add>, %216, %cst_110 [1] : vector<16x32xf32> to vector<16xf32>
      %218 = vector.shape_cast %217 : vector<16xf32> to vector<16x1xf32>
      %cst_111 = arith.constant 3.200000e+01 : f32
      %219 = vector.broadcast %cst_111 : f32 to vector<16x1xf32>
      %220 = arith.divf %218, %219 : vector<16x1xf32>
      %221 = vector.broadcast %213 : vector<16x1xf32> to vector<16x32xf32>
      %222 = arith.subf %209, %221 : vector<16x32xf32>
      %cst_112 = arith.constant 9.99999974E-6 : f32
      %223 = vector.broadcast %cst_112 : f32 to vector<16x1xf32>
      %224 = arith.addf %220, %223 : vector<16x1xf32>
      %225 = math.rsqrt %224 : vector<16x1xf32>
      %226 = vector.broadcast %225 : vector<16x1xf32> to vector<16x32xf32>
      %227 = arith.mulf %222, %226 : vector<16x32xf32>
      %228 = vector.broadcast %0 : vector<1x32xf32> to vector<16x32xf32>
      %229 = arith.mulf %227, %228 : vector<16x32xf32>
      %230 = vector.broadcast %1 : vector<1x32xf32> to vector<16x32xf32>
      %231 = arith.addf %229, %230 : vector<16x32xf32>
      %232 = arith.truncf %231 : vector<16x32xf32> to vector<16x32xbf16>
      %c0_113 = arith.constant 0 : index
      %c0_114 = arith.constant 0 : index
      %233 = vector.load %arg19[%c0_113, %c0_114] : memref<16x32xbf16, #tpu.memory_space<vmem>>, vector<16x32xbf16>
      tpu.vector_store %arg19[%c0_113, %c0_114], %232 {strides = array<i32>} : memref<16x32xbf16, #tpu.memory_space<vmem>>, vector<16x32xbf16>,
      %c0_115 = arith.constant 0 : index
      %c0_116 = arith.constant 0 : index
      %234 = vector.load %arg8[%c0_115, %c0_116] : memref<32x32xbf16, #tpu.memory_space<vmem>>, vector<32x32xbf16>
      %cst_117 = arith.constant dense<0.000000e+00> : vector<16x32xf32>
      %235 = tpu.matmul %232, %234, %cst_117 {dimension_numbers = #tpu.dot_dimension_numbers<[1], [0], [0], [1], [0, 0, 1, 1], [], []>} : vector<16x32xbf16>, vector<32x32xbf16>, vector<16x32xf32> -> vector<16x32xf32>
      %236 = arith.truncf %235 : vector<16x32xf32> to vector<16x32xbf16>
      %c0_118 = arith.constant 0 : index
      %c0_119 = arith.constant 0 : index
      %237 = vector.load %arg9[%c0_118, %c0_119] : memref<32x32xbf16, #tpu.memory_space<vmem>>, vector<32x32xbf16>
      %cst_120 = arith.constant dense<0.000000e+00> : vector<16x32xf32>
      %238 = tpu.matmul %232, %237, %cst_120 {dimension_numbers = #tpu.dot_dimension_numbers<[1], [0], [0], [1], [0, 0, 1, 1], [], []>} : vector<16x32xbf16>, vector<32x32xbf16>, vector<16x32xf32> -> vector<16x32xf32>
      %239 = arith.truncf %238 : vector<16x32xf32> to vector<16x32xbf16>
      %240 = vector.extract_strided_slice %236 {offsets = [0, 0], sizes = [16, 8], strides = [1, 1]} : vector<16x32xbf16> to vector<16x8xbf16>
      %c0_121 = arith.constant 0 : index
      %c0_122 = arith.constant 0 : index
      %c0_123 = arith.constant 0 : index
      %241 = vector.load %arg20[%c0_121, %c0_122, %c0_123] : memref<4x16x8xbf16, #tpu.memory_space<vmem>>, vector<1x16x8xbf16>
      %242 = vector.shape_cast %241 : vector<1x16x8xbf16> to vector<16x8xbf16>
      %243 = vector.shape_cast %240 : vector<16x8xbf16> to vector<1x16x8xbf16>
      tpu.vector_store %arg20[%c0_121, %c0_122, %c0_123], %243 {strides = array<i32>} : memref<4x16x8xbf16, #tpu.memory_space<vmem>>, vector<1x16x8xbf16>,
      %244 = vector.extract_strided_slice %239 {offsets = [0, 0], sizes = [16, 8], strides = [1, 1]} : vector<16x32xbf16> to vector<16x8xbf16>
      %c0_124 = arith.constant 0 : index
      %c0_125 = arith.constant 0 : index
      %c0_126 = arith.constant 0 : index
      %245 = vector.load %arg21[%c0_124, %c0_125, %c0_126] : memref<4x16x8xbf16, #tpu.memory_space<vmem>>, vector<1x16x8xbf16>
      %246 = vector.shape_cast %245 : vector<1x16x8xbf16> to vector<16x8xbf16>
      %247 = vector.shape_cast %244 : vector<16x8xbf16> to vector<1x16x8xbf16>
      tpu.vector_store %arg21[%c0_124, %c0_125, %c0_126], %247 {strides = array<i32>} : memref<4x16x8xbf16, #tpu.memory_space<vmem>>, vector<1x16x8xbf16>,
      %248 = vector.extract_strided_slice %236 {offsets = [0, 8], sizes = [16, 8], strides = [1, 1]} : vector<16x32xbf16> to vector<16x8xbf16>
      %c1_127 = arith.constant 1 : index
      %c0_128 = arith.constant 0 : index
      %c0_129 = arith.constant 0 : index
      %249 = vector.load %arg20[%c1_127, %c0_128, %c0_129] : memref<4x16x8xbf16, #tpu.memory_space<vmem>>, vector<1x16x8xbf16>
      %250 = vector.shape_cast %249 : vector<1x16x8xbf16> to vector<16x8xbf16>
      %251 = vector.shape_cast %248 : vector<16x8xbf16> to vector<1x16x8xbf16>
      tpu.vector_store %arg20[%c1_127, %c0_128, %c0_129], %251 {strides = array<i32>} : memref<4x16x8xbf16, #tpu.memory_space<vmem>>, vector<1x16x8xbf16>,
      %252 = vector.extract_strided_slice %239 {offsets = [0, 8], sizes = [16, 8], strides = [1, 1]} : vector<16x32xbf16> to vector<16x8xbf16>
      %c1_130 = arith.constant 1 : index
      %c0_131 = arith.constant 0 : index
      %c0_132 = arith.constant 0 : index
      %253 = vector.load %arg21[%c1_130, %c0_131, %c0_132] : memref<4x16x8xbf16, #tpu.memory_space<vmem>>, vector<1x16x8xbf16>
      %254 = vector.shape_cast %253 : vector<1x16x8xbf16> to vector<16x8xbf16>
      %255 = vector.shape_cast %252 : vector<16x8xbf16> to vector<1x16x8xbf16>
      tpu.vector_store %arg21[%c1_130, %c0_131, %c0_132], %255 {strides = array<i32>} : memref<4x16x8xbf16, #tpu.memory_space<vmem>>, vector<1x16x8xbf16>,
      %256 = vector.extract_strided_slice %236 {offsets = [0, 16], sizes = [16, 8], strides = [1, 1]} : vector<16x32xbf16> to vector<16x8xbf16>
      %c2_133 = arith.constant 2 : index
      %c0_134 = arith.constant 0 : index
      %c0_135 = arith.constant 0 : index
      %257 = vector.load %arg20[%c2_133, %c0_134, %c0_135] : memref<4x16x8xbf16, #tpu.memory_space<vmem>>, vector<1x16x8xbf16>
      %258 = vector.shape_cast %257 : vector<1x16x8xbf16> to vector<16x8xbf16>
      %259 = vector.shape_cast %256 : vector<16x8xbf16> to vector<1x16x8xbf16>
      tpu.vector_store %arg20[%c2_133, %c0_134, %c0_135], %259 {strides = array<i32>} : memref<4x16x8xbf16, #tpu.memory_space<vmem>>, vector<1x16x8xbf16>,
      %260 = vector.extract_strided_slice %239 {offsets = [0, 16], sizes = [16, 8], strides = [1, 1]} : vector<16x32xbf16> to vector<16x8xbf16>
      %c2_136 = arith.constant 2 : index
      %c0_137 = arith.constant 0 : index
      %c0_138 = arith.constant 0 : index
      %261 = vector.load %arg21[%c2_136, %c0_137, %c0_138] : memref<4x16x8xbf16, #tpu.memory_space<vmem>>, vector<1x16x8xbf16>
      %262 = vector.shape_cast %261 : vector<1x16x8xbf16> to vector<16x8xbf16>
      %263 = vector.shape_cast %260 : vector<16x8xbf16> to vector<1x16x8xbf16>
      tpu.vector_store %arg21[%c2_136, %c0_137, %c0_138], %263 {strides = array<i32>} : memref<4x16x8xbf16, #tpu.memory_space<vmem>>, vector<1x16x8xbf16>,
      %264 = vector.extract_strided_slice %236 {offsets = [0, 24], sizes = [16, 8], strides = [1, 1]} : vector<16x32xbf16> to vector<16x8xbf16>
      %c3_139 = arith.constant 3 : index
      %c0_140 = arith.constant 0 : index
      %c0_141 = arith.constant 0 : index
      %265 = vector.load %arg20[%c3_139, %c0_140, %c0_141] : memref<4x16x8xbf16, #tpu.memory_space<vmem>>, vector<1x16x8xbf16>
      %266 = vector.shape_cast %265 : vector<1x16x8xbf16> to vector<16x8xbf16>
      %267 = vector.shape_cast %264 : vector<16x8xbf16> to vector<1x16x8xbf16>
      tpu.vector_store %arg20[%c3_139, %c0_140, %c0_141], %267 {strides = array<i32>} : memref<4x16x8xbf16, #tpu.memory_space<vmem>>, vector<1x16x8xbf16>,
      %268 = vector.extract_strided_slice %239 {offsets = [0, 24], sizes = [16, 8], strides = [1, 1]} : vector<16x32xbf16> to vector<16x8xbf16>
      %c3_142 = arith.constant 3 : index
      %c0_143 = arith.constant 0 : index
      %c0_144 = arith.constant 0 : index
      %269 = vector.load %arg21[%c3_142, %c0_143, %c0_144] : memref<4x16x8xbf16, #tpu.memory_space<vmem>>, vector<1x16x8xbf16>
      %270 = vector.shape_cast %269 : vector<1x16x8xbf16> to vector<16x8xbf16>
      %271 = vector.shape_cast %268 : vector<16x8xbf16> to vector<1x16x8xbf16>
      tpu.vector_store %arg21[%c3_142, %c0_143, %c0_144], %271 {strides = array<i32>} : memref<4x16x8xbf16, #tpu.memory_space<vmem>>, vector<1x16x8xbf16>,
    } else {
    }
    %c16_i32 = arith.constant 16 : i32
    %5 = arith.muli %arg1, %c16_i32 : i32
    %6 = tpu.assume_multiple %5, 16 : i32
    %c0_4 = arith.constant 0 : index
    %c0_5 = arith.constant 0 : index
    %c0_6 = arith.constant 0 : index
    %7 = vector.load %arg3[%c0_4, %c0_5, %c0_6] : memref<1x16x32xf32, #tpu.memory_space<vmem>>, vector<1x16x32xf32>
    %8 = vector.shape_cast %7 : vector<1x16x32xf32> to vector<16x32xf32>
    %9 = arith.index_cast %6 : i32 to index
    %c0_7 = arith.constant 0 : index
    %10 = vector.load %arg19[%9, %c0_7] : memref<16x32xbf16, #tpu.memory_space<vmem>>, vector<16x32xbf16>
    %c0_8 = arith.constant 0 : index
    %c0_9 = arith.constant 0 : index
    %11 = vector.load %arg7[%c0_8, %c0_9] : memref<32x32xbf16, #tpu.memory_space<vmem>>, vector<32x32xbf16>
    %cst = arith.constant dense<0.000000e+00> : vector<16x32xf32>
    %12 = tpu.matmul %10, %11, %cst {dimension_numbers = #tpu.dot_dimension_numbers<[1], [0], [0], [1], [0, 0, 1, 1], [], []>} : vector<16x32xbf16>, vector<32x32xbf16>, vector<16x32xf32> -> vector<16x32xf32>
    %13 = arith.truncf %12 : vector<16x32xf32> to vector<16x32xbf16>
    %14 = tpu.iota {dimensions = array<i32: 1>} : vector<1x16xi32>
    %c8_i32 = arith.constant 8 : i32
    %15 = vector.broadcast %c8_i32 : i32 to vector<1x16xi32>
    %16 = arith.cmpi slt, %14, %15 : vector<1x16xi32>
    %cst_10 = arith.constant 0.000000e+00 : f32
    %cst_11 = arith.constant -1.000000e+30 : f32
    %17 = vector.broadcast %cst_10 : f32 to vector<1x16xf32>
    %18 = vector.broadcast %cst_11 : f32 to vector<1x16xf32>
    %19 = arith.select %16, %17, %18 : vector<1x16xi1>, vector<1x16xf32>
    %c0_12 = arith.constant 0 : index
    %c0_13 = arith.constant 0 : index
    %c0_14 = arith.constant 0 : index
    %20 = vector.load %arg2[%c0_12, %c0_13, %c0_14] : memref<1x1x16xf32, #tpu.memory_space<vmem>>, vector<1x1x16xf32>
    %21 = vector.shape_cast %20 : vector<1x1x16xf32> to vector<1x16xf32>
    %22 = tpu.iota {dimensions = array<i32: 0>} : vector<16x16xi32>
    %23 = vector.broadcast %6 : i32 to vector<16x16xi32>
    %24 = arith.addi %23, %22 : vector<16x16xi32>
    %25 = tpu.iota {dimensions = array<i32: 1>} : vector<16x16xi32>
    %26 = arith.cmpi eq, %24, %25 : vector<16x16xi32>
    %cst_15 = arith.constant 1.000000e+00 : f32
    %27 = vector.broadcast %cst_15 : f32 to vector<16x16xf32>
    %28 = vector.shape_cast %21 : vector<1x16xf32> to vector<1x16xf32>
    %29 = vector.broadcast %28 : vector<1x16xf32> to vector<16x16xf32>
    %30 = arith.select %26, %27, %29 : vector<16x16xi1>, vector<16x16xf32>
    %c0_16 = arith.constant 0 : index
    %c0_17 = arith.constant 0 : index
    %31 = vector.load %arg11[%c0_16, %c0_17] : memref<1x32xf32, #tpu.memory_space<vmem>>, vector<1x32xf32>
    %32 = vector.shape_cast %31 : vector<1x32xf32> to vector<1x32xf32>
    %33 = vector.broadcast %32 : vector<1x32xf32> to vector<16x32xf32>
    %34 = vector.extract_strided_slice %13 {offsets = [0, 0], sizes = [16, 8], strides = [1, 1]} : vector<16x32xbf16> to vector<16x8xbf16>
    %c0_18 = arith.constant 0 : index
    %c0_19 = arith.constant 0 : index
    %c0_20 = arith.constant 0 : index
    %35 = vector.load %arg20[%c0_18, %c0_19, %c0_20] : memref<4x16x8xbf16, #tpu.memory_space<vmem>>, vector<1x16x8xbf16>
    %36 = vector.shape_cast %35 : vector<1x16x8xbf16> to vector<16x8xbf16>
    %c0_21 = arith.constant 0 : index
    %c0_22 = arith.constant 0 : index
    %c0_23 = arith.constant 0 : index
    %37 = vector.load %arg21[%c0_21, %c0_22, %c0_23] : memref<4x16x8xbf16, #tpu.memory_space<vmem>>, vector<1x16x8xbf16>
    %38 = vector.shape_cast %37 : vector<1x16x8xbf16> to vector<16x8xbf16>
    %cst_24 = arith.constant dense<0.000000e+00> : vector<16x16xf32>
    %39 = tpu.matmul %34, %36, %cst_24 {dimension_numbers = #tpu.dot_dimension_numbers<[1], [1], [0], [0], [0, 0, 1, 0], [], []>} : vector<16x8xbf16>, vector<16x8xbf16>, vector<16x16xf32> -> vector<16x16xf32>
    %40 = vector.broadcast %19 : vector<1x16xf32> to vector<16x16xf32>
    %41 = arith.addf %39, %40 : vector<16x16xf32>
    %cst_25 = arith.constant dense<0xFF800000> : vector<16xf32>
    %42 = vector.multi_reduction <maximumf>, %41, %cst_25 [1] : vector<16x16xf32> to vector<16xf32>
    %43 = vector.shape_cast %42 : vector<16xf32> to vector<16x1xf32>
    %44 = vector.broadcast %43 : vector<16x1xf32> to vector<16x16xf32>
    %45 = arith.subf %41, %44 : vector<16x16xf32>
    %46 = math.exp %45 : vector<16x16xf32>
    %47 = arith.mulf %46, %30 : vector<16x16xf32>
    %cst_26 = arith.constant 1.250000e-07 : f32
    %48 = vector.broadcast %cst_26 : f32 to vector<16x16xf32>
    %49 = arith.addf %47, %48 : vector<16x16xf32>
    %cst_27 = arith.constant dense<0.000000e+00> : vector<16xf32>
    %50 = vector.multi_reduction <add>, %47, %cst_27 [1] : vector<16x16xf32> to vector<16xf32>
    %51 = vector.shape_cast %50 : vector<16xf32> to vector<16x1xf32>
    %cst_28 = arith.constant 9.99999997E-7 : f32
    %52 = vector.broadcast %cst_28 : f32 to vector<16x1xf32>
    %53 = arith.addf %51, %52 : vector<16x1xf32>
    %54 = tpu.reciprocal %53 {approx = true} : vector<16x1xf32> -> vector<16x1xf32>
    %55 = vector.broadcast %54 : vector<16x1xf32> to vector<16x16xf32>
    %56 = arith.mulf %49, %55 : vector<16x16xf32>
    %57 = arith.truncf %56 : vector<16x16xf32> to vector<16x16xbf16>
    %cst_29 = arith.constant dense<0.000000e+00> : vector<16x8xf32>
    %58 = tpu.matmul %57, %38, %cst_29 {dimension_numbers = #tpu.dot_dimension_numbers<[1], [0], [0], [1], [0, 0, 1, 1], [], []>} : vector<16x16xbf16>, vector<16x8xbf16>, vector<16x8xf32> -> vector<16x8xf32>
    %59 = arith.truncf %58 : vector<16x8xf32> to vector<16x8xbf16>
    %c0_30 = arith.constant 0 : index
    %c0_31 = arith.constant 0 : index
    %c0_32 = arith.constant 0 : index
    %60 = vector.load %arg10[%c0_30, %c0_31, %c0_32] : memref<4x8x32xbf16, #tpu.memory_space<vmem>>, vector<1x8x32xbf16>
    %61 = vector.shape_cast %60 : vector<1x8x32xbf16> to vector<8x32xbf16>
    %cst_33 = arith.constant dense<0.000000e+00> : vector<16x32xf32>
    %62 = tpu.matmul %59, %61, %cst_33 {dimension_numbers = #tpu.dot_dimension_numbers<[1], [0], [0], [1], [0, 0, 1, 1], [], []>} : vector<16x8xbf16>, vector<8x32xbf16>, vector<16x32xf32> -> vector<16x32xf32>
    %63 = arith.addf %33, %62 : vector<16x32xf32>
    %64 = vector.extract_strided_slice %13 {offsets = [0, 8], sizes = [16, 8], strides = [1, 1]} : vector<16x32xbf16> to vector<16x8xbf16>
    %c1 = arith.constant 1 : index
    %c0_34 = arith.constant 0 : index
    %c0_35 = arith.constant 0 : index
    %65 = vector.load %arg20[%c1, %c0_34, %c0_35] : memref<4x16x8xbf16, #tpu.memory_space<vmem>>, vector<1x16x8xbf16>
    %66 = vector.shape_cast %65 : vector<1x16x8xbf16> to vector<16x8xbf16>
    %c1_36 = arith.constant 1 : index
    %c0_37 = arith.constant 0 : index
    %c0_38 = arith.constant 0 : index
    %67 = vector.load %arg21[%c1_36, %c0_37, %c0_38] : memref<4x16x8xbf16, #tpu.memory_space<vmem>>, vector<1x16x8xbf16>
    %68 = vector.shape_cast %67 : vector<1x16x8xbf16> to vector<16x8xbf16>
    %cst_39 = arith.constant dense<0.000000e+00> : vector<16x16xf32>
    %69 = tpu.matmul %64, %66, %cst_39 {dimension_numbers = #tpu.dot_dimension_numbers<[1], [1], [0], [0], [0, 0, 1, 0], [], []>} : vector<16x8xbf16>, vector<16x8xbf16>, vector<16x16xf32> -> vector<16x16xf32>
    %70 = vector.broadcast %19 : vector<1x16xf32> to vector<16x16xf32>
    %71 = arith.addf %69, %70 : vector<16x16xf32>
    %cst_40 = arith.constant dense<0xFF800000> : vector<16xf32>
    %72 = vector.multi_reduction <maximumf>, %71, %cst_40 [1] : vector<16x16xf32> to vector<16xf32>
    %73 = vector.shape_cast %72 : vector<16xf32> to vector<16x1xf32>
    %74 = vector.broadcast %73 : vector<16x1xf32> to vector<16x16xf32>
    %75 = arith.subf %71, %74 : vector<16x16xf32>
    %76 = math.exp %75 : vector<16x16xf32>
    %77 = arith.mulf %76, %30 : vector<16x16xf32>
    %cst_41 = arith.constant 1.250000e-07 : f32
    %78 = vector.broadcast %cst_41 : f32 to vector<16x16xf32>
    %79 = arith.addf %77, %78 : vector<16x16xf32>
    %cst_42 = arith.constant dense<0.000000e+00> : vector<16xf32>
    %80 = vector.multi_reduction <add>, %77, %cst_42 [1] : vector<16x16xf32> to vector<16xf32>
    %81 = vector.shape_cast %80 : vector<16xf32> to vector<16x1xf32>
    %cst_43 = arith.constant 9.99999997E-7 : f32
    %82 = vector.broadcast %cst_43 : f32 to vector<16x1xf32>
    %83 = arith.addf %81, %82 : vector<16x1xf32>
    %84 = tpu.reciprocal %83 {approx = true} : vector<16x1xf32> -> vector<16x1xf32>
    %85 = vector.broadcast %84 : vector<16x1xf32> to vector<16x16xf32>
    %86 = arith.mulf %79, %85 : vector<16x16xf32>
    %87 = arith.truncf %86 : vector<16x16xf32> to vector<16x16xbf16>
    %cst_44 = arith.constant dense<0.000000e+00> : vector<16x8xf32>
    %88 = tpu.matmul %87, %68, %cst_44 {dimension_numbers = #tpu.dot_dimension_numbers<[1], [0], [0], [1], [0, 0, 1, 1], [], []>} : vector<16x16xbf16>, vector<16x8xbf16>, vector<16x8xf32> -> vector<16x8xf32>
    %89 = arith.truncf %88 : vector<16x8xf32> to vector<16x8xbf16>
    %c1_45 = arith.constant 1 : index
    %c0_46 = arith.constant 0 : index
    %c0_47 = arith.constant 0 : index
    %90 = vector.load %arg10[%c1_45, %c0_46, %c0_47] : memref<4x8x32xbf16, #tpu.memory_space<vmem>>, vector<1x8x32xbf16>
    %91 = vector.shape_cast %90 : vector<1x8x32xbf16> to vector<8x32xbf16>
    %cst_48 = arith.constant dense<0.000000e+00> : vector<16x32xf32>
    %92 = tpu.matmul %89, %91, %cst_48 {dimension_numbers = #tpu.dot_dimension_numbers<[1], [0], [0], [1], [0, 0, 1, 1], [], []>} : vector<16x8xbf16>, vector<8x32xbf16>, vector<16x32xf32> -> vector<16x32xf32>
    %93 = arith.addf %63, %92 : vector<16x32xf32>
    %94 = vector.extract_strided_slice %13 {offsets = [0, 16], sizes = [16, 8], strides = [1, 1]} : vector<16x32xbf16> to vector<16x8xbf16>
    %c2 = arith.constant 2 : index
    %c0_49 = arith.constant 0 : index
    %c0_50 = arith.constant 0 : index
    %95 = vector.load %arg20[%c2, %c0_49, %c0_50] : memref<4x16x8xbf16, #tpu.memory_space<vmem>>, vector<1x16x8xbf16>
    %96 = vector.shape_cast %95 : vector<1x16x8xbf16> to vector<16x8xbf16>
    %c2_51 = arith.constant 2 : index
    %c0_52 = arith.constant 0 : index
    %c0_53 = arith.constant 0 : index
    %97 = vector.load %arg21[%c2_51, %c0_52, %c0_53] : memref<4x16x8xbf16, #tpu.memory_space<vmem>>, vector<1x16x8xbf16>
    %98 = vector.shape_cast %97 : vector<1x16x8xbf16> to vector<16x8xbf16>
    %cst_54 = arith.constant dense<0.000000e+00> : vector<16x16xf32>
    %99 = tpu.matmul %94, %96, %cst_54 {dimension_numbers = #tpu.dot_dimension_numbers<[1], [1], [0], [0], [0, 0, 1, 0], [], []>} : vector<16x8xbf16>, vector<16x8xbf16>, vector<16x16xf32> -> vector<16x16xf32>
    %100 = vector.broadcast %19 : vector<1x16xf32> to vector<16x16xf32>
    %101 = arith.addf %99, %100 : vector<16x16xf32>
    %cst_55 = arith.constant dense<0xFF800000> : vector<16xf32>
    %102 = vector.multi_reduction <maximumf>, %101, %cst_55 [1] : vector<16x16xf32> to vector<16xf32>
    %103 = vector.shape_cast %102 : vector<16xf32> to vector<16x1xf32>
    %104 = vector.broadcast %103 : vector<16x1xf32> to vector<16x16xf32>
    %105 = arith.subf %101, %104 : vector<16x16xf32>
    %106 = math.exp %105 : vector<16x16xf32>
    %107 = arith.mulf %106, %30 : vector<16x16xf32>
    %cst_56 = arith.constant 1.250000e-07 : f32
    %108 = vector.broadcast %cst_56 : f32 to vector<16x16xf32>
    %109 = arith.addf %107, %108 : vector<16x16xf32>
    %cst_57 = arith.constant dense<0.000000e+00> : vector<16xf32>
    %110 = vector.multi_reduction <add>, %107, %cst_57 [1] : vector<16x16xf32> to vector<16xf32>
    %111 = vector.shape_cast %110 : vector<16xf32> to vector<16x1xf32>
    %cst_58 = arith.constant 9.99999997E-7 : f32
    %112 = vector.broadcast %cst_58 : f32 to vector<16x1xf32>
    %113 = arith.addf %111, %112 : vector<16x1xf32>
    %114 = tpu.reciprocal %113 {approx = true} : vector<16x1xf32> -> vector<16x1xf32>
    %115 = vector.broadcast %114 : vector<16x1xf32> to vector<16x16xf32>
    %116 = arith.mulf %109, %115 : vector<16x16xf32>
    %117 = arith.truncf %116 : vector<16x16xf32> to vector<16x16xbf16>
    %cst_59 = arith.constant dense<0.000000e+00> : vector<16x8xf32>
    %118 = tpu.matmul %117, %98, %cst_59 {dimension_numbers = #tpu.dot_dimension_numbers<[1], [0], [0], [1], [0, 0, 1, 1], [], []>} : vector<16x16xbf16>, vector<16x8xbf16>, vector<16x8xf32> -> vector<16x8xf32>
    %119 = arith.truncf %118 : vector<16x8xf32> to vector<16x8xbf16>
    %c2_60 = arith.constant 2 : index
    %c0_61 = arith.constant 0 : index
    %c0_62 = arith.constant 0 : index
    %120 = vector.load %arg10[%c2_60, %c0_61, %c0_62] : memref<4x8x32xbf16, #tpu.memory_space<vmem>>, vector<1x8x32xbf16>
    %121 = vector.shape_cast %120 : vector<1x8x32xbf16> to vector<8x32xbf16>
    %cst_63 = arith.constant dense<0.000000e+00> : vector<16x32xf32>
    %122 = tpu.matmul %119, %121, %cst_63 {dimension_numbers = #tpu.dot_dimension_numbers<[1], [0], [0], [1], [0, 0, 1, 1], [], []>} : vector<16x8xbf16>, vector<8x32xbf16>, vector<16x32xf32> -> vector<16x32xf32>
    %123 = arith.addf %93, %122 : vector<16x32xf32>
    %124 = vector.extract_strided_slice %13 {offsets = [0, 24], sizes = [16, 8], strides = [1, 1]} : vector<16x32xbf16> to vector<16x8xbf16>
    %c3 = arith.constant 3 : index
    %c0_64 = arith.constant 0 : index
    %c0_65 = arith.constant 0 : index
    %125 = vector.load %arg20[%c3, %c0_64, %c0_65] : memref<4x16x8xbf16, #tpu.memory_space<vmem>>, vector<1x16x8xbf16>
    %126 = vector.shape_cast %125 : vector<1x16x8xbf16> to vector<16x8xbf16>
    %c3_66 = arith.constant 3 : index
    %c0_67 = arith.constant 0 : index
    %c0_68 = arith.constant 0 : index
    %127 = vector.load %arg21[%c3_66, %c0_67, %c0_68] : memref<4x16x8xbf16, #tpu.memory_space<vmem>>, vector<1x16x8xbf16>
    %128 = vector.shape_cast %127 : vector<1x16x8xbf16> to vector<16x8xbf16>
    %cst_69 = arith.constant dense<0.000000e+00> : vector<16x16xf32>
    %129 = tpu.matmul %124, %126, %cst_69 {dimension_numbers = #tpu.dot_dimension_numbers<[1], [1], [0], [0], [0, 0, 1, 0], [], []>} : vector<16x8xbf16>, vector<16x8xbf16>, vector<16x16xf32> -> vector<16x16xf32>
    %130 = vector.broadcast %19 : vector<1x16xf32> to vector<16x16xf32>
    %131 = arith.addf %129, %130 : vector<16x16xf32>
    %cst_70 = arith.constant dense<0xFF800000> : vector<16xf32>
    %132 = vector.multi_reduction <maximumf>, %131, %cst_70 [1] : vector<16x16xf32> to vector<16xf32>
    %133 = vector.shape_cast %132 : vector<16xf32> to vector<16x1xf32>
    %134 = vector.broadcast %133 : vector<16x1xf32> to vector<16x16xf32>
    %135 = arith.subf %131, %134 : vector<16x16xf32>
    %136 = math.exp %135 : vector<16x16xf32>
    %137 = arith.mulf %136, %30 : vector<16x16xf32>
    %cst_71 = arith.constant 1.250000e-07 : f32
    %138 = vector.broadcast %cst_71 : f32 to vector<16x16xf32>
    %139 = arith.addf %137, %138 : vector<16x16xf32>
    %cst_72 = arith.constant dense<0.000000e+00> : vector<16xf32>
    %140 = vector.multi_reduction <add>, %137, %cst_72 [1] : vector<16x16xf32> to vector<16xf32>
    %141 = vector.shape_cast %140 : vector<16xf32> to vector<16x1xf32>
    %cst_73 = arith.constant 9.99999997E-7 : f32
    %142 = vector.broadcast %cst_73 : f32 to vector<16x1xf32>
    %143 = arith.addf %141, %142 : vector<16x1xf32>
    %144 = tpu.reciprocal %143 {approx = true} : vector<16x1xf32> -> vector<16x1xf32>
    %145 = vector.broadcast %144 : vector<16x1xf32> to vector<16x16xf32>
    %146 = arith.mulf %139, %145 : vector<16x16xf32>
    %147 = arith.truncf %146 : vector<16x16xf32> to vector<16x16xbf16>
    %cst_74 = arith.constant dense<0.000000e+00> : vector<16x8xf32>
    %148 = tpu.matmul %147, %128, %cst_74 {dimension_numbers = #tpu.dot_dimension_numbers<[1], [0], [0], [1], [0, 0, 1, 1], [], []>} : vector<16x16xbf16>, vector<16x8xbf16>, vector<16x8xf32> -> vector<16x8xf32>
    %149 = arith.truncf %148 : vector<16x8xf32> to vector<16x8xbf16>
    %c3_75 = arith.constant 3 : index
    %c0_76 = arith.constant 0 : index
    %c0_77 = arith.constant 0 : index
    %150 = vector.load %arg10[%c3_75, %c0_76, %c0_77] : memref<4x8x32xbf16, #tpu.memory_space<vmem>>, vector<1x8x32xbf16>
    %151 = vector.shape_cast %150 : vector<1x8x32xbf16> to vector<8x32xbf16>
    %cst_78 = arith.constant dense<0.000000e+00> : vector<16x32xf32>
    %152 = tpu.matmul %149, %151, %cst_78 {dimension_numbers = #tpu.dot_dimension_numbers<[1], [0], [0], [1], [0, 0, 1, 1], [], []>} : vector<16x8xbf16>, vector<8x32xbf16>, vector<16x32xf32> -> vector<16x32xf32>
    %153 = arith.addf %123, %152 : vector<16x32xf32>
    %154 = arith.addf %8, %153 : vector<16x32xf32>
    %c0_79 = arith.constant 0 : index
    %c0_80 = arith.constant 0 : index
    %155 = vector.load %arg12[%c0_79, %c0_80] : memref<1x32xf32, #tpu.memory_space<vmem>>, vector<1x32xf32>
    %c0_81 = arith.constant 0 : index
    %c0_82 = arith.constant 0 : index
    %156 = vector.load %arg13[%c0_81, %c0_82] : memref<1x32xf32, #tpu.memory_space<vmem>>, vector<1x32xf32>
    %cst_83 = arith.constant dense<0.000000e+00> : vector<16xf32>
    %157 = vector.multi_reduction <add>, %154, %cst_83 [1] : vector<16x32xf32> to vector<16xf32>
    %158 = vector.shape_cast %157 : vector<16xf32> to vector<16x1xf32>
    %cst_84 = arith.constant 3.200000e+01 : f32
    %159 = vector.broadcast %cst_84 : f32 to vector<16x1xf32>
    %160 = arith.divf %158, %159 : vector<16x1xf32>
    %161 = vector.broadcast %160 : vector<16x1xf32> to vector<16x32xf32>
    %162 = arith.subf %154, %161 : vector<16x32xf32>
    %163 = arith.mulf %162, %162 : vector<16x32xf32>
    %cst_85 = arith.constant dense<0.000000e+00> : vector<16xf32>
    %164 = vector.multi_reduction <add>, %163, %cst_85 [1] : vector<16x32xf32> to vector<16xf32>
    %165 = vector.shape_cast %164 : vector<16xf32> to vector<16x1xf32>
    %cst_86 = arith.constant 3.200000e+01 : f32
    %166 = vector.broadcast %cst_86 : f32 to vector<16x1xf32>
    %167 = arith.divf %165, %166 : vector<16x1xf32>
    %168 = vector.broadcast %160 : vector<16x1xf32> to vector<16x32xf32>
    %169 = arith.subf %154, %168 : vector<16x32xf32>
    %cst_87 = arith.constant 9.99999974E-6 : f32
    %170 = vector.broadcast %cst_87 : f32 to vector<16x1xf32>
    %171 = arith.addf %167, %170 : vector<16x1xf32>
    %172 = math.rsqrt %171 : vector<16x1xf32>
    %173 = vector.broadcast %172 : vector<16x1xf32> to vector<16x32xf32>
    %174 = arith.mulf %169, %173 : vector<16x32xf32>
    %175 = vector.broadcast %155 : vector<1x32xf32> to vector<16x32xf32>
    %176 = arith.mulf %174, %175 : vector<16x32xf32>
    %177 = vector.broadcast %156 : vector<1x32xf32> to vector<16x32xf32>
    %178 = arith.addf %176, %177 : vector<16x32xf32>
    %179 = arith.truncf %178 : vector<16x32xf32> to vector<16x32xbf16>
    %c0_88 = arith.constant 0 : index
    %c0_89 = arith.constant 0 : index
    %180 = vector.load %arg14[%c0_88, %c0_89] : memref<32x128xbf16, #tpu.memory_space<vmem>>, vector<32x128xbf16>
    %cst_90 = arith.constant dense<0.000000e+00> : vector<16x128xf32>
    %181 = tpu.matmul %179, %180, %cst_90 {dimension_numbers = #tpu.dot_dimension_numbers<[1], [0], [0], [1], [0, 0, 1, 1], [], []>} : vector<16x32xbf16>, vector<32x128xbf16>, vector<16x128xf32> -> vector<16x128xf32>
    %c0_91 = arith.constant 0 : index
    %c0_92 = arith.constant 0 : index
    %182 = vector.load %arg15[%c0_91, %c0_92] : memref<1x128xf32, #tpu.memory_space<vmem>>, vector<1x128xf32>
    %183 = vector.broadcast %182 : vector<1x128xf32> to vector<16x128xf32>
    %184 = arith.addf %181, %183 : vector<16x128xf32>
    %cst_93 = arith.constant 5.000000e-01 : f32
    %185 = vector.broadcast %cst_93 : f32 to vector<16x128xf32>
    %186 = arith.mulf %185, %184 : vector<16x128xf32>
    %cst_94 = arith.constant 4.471500e-02 : f32
    %187 = vector.broadcast %cst_94 : f32 to vector<16x128xf32>
    %188 = arith.mulf %187, %184 : vector<16x128xf32>
    %189 = arith.mulf %188, %184 : vector<16x128xf32>
    %190 = arith.mulf %189, %184 : vector<16x128xf32>
    %191 = arith.addf %184, %190 : vector<16x128xf32>
    %cst_95 = arith.constant 0.797884583 : f32
    %192 = vector.broadcast %cst_95 : f32 to vector<16x128xf32>
    %193 = arith.mulf %192, %191 : vector<16x128xf32>
    %194 = math.tanh %193 : vector<16x128xf32>
    %cst_96 = arith.constant 1.000000e+00 : f32
    %195 = vector.broadcast %cst_96 : f32 to vector<16x128xf32>
    %196 = arith.addf %195, %194 : vector<16x128xf32>
    %197 = arith.mulf %186, %196 : vector<16x128xf32>
    %198 = arith.truncf %197 : vector<16x128xf32> to vector<16x128xbf16>
    %c0_97 = arith.constant 0 : index
    %c0_98 = arith.constant 0 : index
    %199 = vector.load %arg16[%c0_97, %c0_98] : memref<128x32xbf16, #tpu.memory_space<vmem>>, vector<128x32xbf16>
    %cst_99 = arith.constant dense<0.000000e+00> : vector<16x32xf32>
    %200 = tpu.matmul %198, %199, %cst_99 {dimension_numbers = #tpu.dot_dimension_numbers<[1], [0], [0], [1], [0, 0, 1, 1], [], []>} : vector<16x128xbf16>, vector<128x32xbf16>, vector<16x32xf32> -> vector<16x32xf32>
    %c0_100 = arith.constant 0 : index
    %c0_101 = arith.constant 0 : index
    %201 = vector.load %arg17[%c0_100, %c0_101] : memref<1x32xf32, #tpu.memory_space<vmem>>, vector<1x32xf32>
    %202 = vector.broadcast %201 : vector<1x32xf32> to vector<16x32xf32>
    %203 = arith.addf %200, %202 : vector<16x32xf32>
    %204 = arith.addf %154, %203 : vector<16x32xf32>
    %c0_102 = arith.constant 0 : index
    %c0_103 = arith.constant 0 : index
    %c0_104 = arith.constant 0 : index
    %205 = vector.load %arg18[%c0_102, %c0_103, %c0_104] : memref<1x16x32xf32, #tpu.memory_space<vmem>>, vector<1x16x32xf32>
    %206 = vector.shape_cast %205 : vector<1x16x32xf32> to vector<16x32xf32>
    %207 = vector.shape_cast %204 : vector<16x32xf32> to vector<1x16x32xf32>
    tpu.vector_store %arg18[%c0_102, %c0_103, %c0_104], %207 {strides = array<i32>} : memref<1x16x32xf32, #tpu.memory_space<vmem>>, vector<1x16x32xf32>,
    return
  }
  func.func @transform_0(%arg0: i32, %arg1: i32) -> (i32, i32, i32) {
    %c0_i32 = arith.constant 0 : i32
    %c0_i32_0 = arith.constant 0 : i32
    %c0_i32_1 = arith.constant 0 : i32
    return %arg0, %c0_i32, %c0_i32_0 : i32, i32, i32
  }
  func.func @transform_1(%arg0: i32, %arg1: i32) -> (i32, i32, i32) {
    %c0_i32 = arith.constant 0 : i32
    %c0_i32_0 = arith.constant 0 : i32
    return %arg0, %arg1, %c0_i32 : i32, i32, i32
  }
  func.func @transform_2(%arg0: i32, %arg1: i32) -> (i32, i32, i32) {
    %c0_i32 = arith.constant 0 : i32
    %c0_i32_0 = arith.constant 0 : i32
    %c0_i32_1 = arith.constant 0 : i32
    return %arg0, %c0_i32, %c0_i32_0 : i32, i32, i32
  }
  func.func @transform_3(%arg0: i32, %arg1: i32) -> (i32, i32) {
    %c0_i32 = arith.constant 0 : i32
    %c0_i32_0 = arith.constant 0 : i32
    %c0_i32_1 = arith.constant 0 : i32
    return %c0_i32, %c0_i32_0 : i32, i32
  }
  func.func @transform_4(%arg0: i32, %arg1: i32) -> (i32, i32) {
    %c0_i32 = arith.constant 0 : i32
    %c0_i32_0 = arith.constant 0 : i32
    %c0_i32_1 = arith.constant 0 : i32
    return %c0_i32, %c0_i32_0 : i32, i32
  }
  func.func @transform_5(%arg0: i32, %arg1: i32) -> (i32, i32) {
    %c0_i32 = arith.constant 0 : i32
    %c0_i32_0 = arith.constant 0 : i32
    %c0_i32_1 = arith.constant 0 : i32
    return %c0_i32, %c0_i32_0 : i32, i32
  }
  func.func @transform_6(%arg0: i32, %arg1: i32) -> (i32, i32) {
    %c0_i32 = arith.constant 0 : i32
    %c0_i32_0 = arith.constant 0 : i32
    %c0_i32_1 = arith.constant 0 : i32
    return %c0_i32, %c0_i32_0 : i32, i32
  }
  func.func @transform_7(%arg0: i32, %arg1: i32) -> (i32, i32) {
    %c0_i32 = arith.constant 0 : i32
    %c0_i32_0 = arith.constant 0 : i32
    %c0_i32_1 = arith.constant 0 : i32
    return %c0_i32, %c0_i32_0 : i32, i32
  }
  func.func @transform_8(%arg0: i32, %arg1: i32) -> (i32, i32, i32) {
    %c0_i32 = arith.constant 0 : i32
    %c0_i32_0 = arith.constant 0 : i32
    %c0_i32_1 = arith.constant 0 : i32
    %c0_i32_2 = arith.constant 0 : i32
    return %c0_i32, %c0_i32_0, %c0_i32_1 : i32, i32, i32
  }
  func.func @transform_9(%arg0: i32, %arg1: i32) -> (i32, i32) {
    %c0_i32 = arith.constant 0 : i32
    %c0_i32_0 = arith.constant 0 : i32
    %c0_i32_1 = arith.constant 0 : i32
    return %c0_i32, %c0_i32_0 : i32, i32
  }
  func.func @transform_10(%arg0: i32, %arg1: i32) -> (i32, i32) {
    %c0_i32 = arith.constant 0 : i32
    %c0_i32_0 = arith.constant 0 : i32
    %c0_i32_1 = arith.constant 0 : i32
    return %c0_i32, %c0_i32_0 : i32, i32
  }
  func.func @transform_11(%arg0: i32, %arg1: i32) -> (i32, i32) {
    %c0_i32 = arith.constant 0 : i32
    %c0_i32_0 = arith.constant 0 : i32
    %c0_i32_1 = arith.constant 0 : i32
    return %c0_i32, %c0_i32_0 : i32, i32
  }
  func.func @transform_12(%arg0: i32, %arg1: i32) -> (i32, i32) {
    %c0_i32 = arith.constant 0 : i32
    %c0_i32_0 = arith.constant 0 : i32
    %c0_i32_1 = arith.constant 0 : i32
    return %c0_i32, %c0_i32_0 : i32, i32
  }
  func.func @transform_13(%arg0: i32, %arg1: i32) -> (i32, i32) {
    %c0_i32 = arith.constant 0 : i32
    %c0_i32_0 = arith.constant 0 : i32
    %c0_i32_1 = arith.constant 0 : i32
    return %c0_i32, %c0_i32_0 : i32, i32
  }
  func.func @transform_14(%arg0: i32, %arg1: i32) -> (i32, i32) {
    %c0_i32 = arith.constant 0 : i32
    %c0_i32_0 = arith.constant 0 : i32
    %c0_i32_1 = arith.constant 0 : i32
    return %c0_i32, %c0_i32_0 : i32, i32
  }
  func.func @transform_15(%arg0: i32, %arg1: i32) -> (i32, i32) {
    %c0_i32 = arith.constant 0 : i32
    %c0_i32_0 = arith.constant 0 : i32
    %c0_i32_1 = arith.constant 0 : i32
    return %c0_i32, %c0_i32_0 : i32, i32
  }
  func.func @transform_16(%arg0: i32, %arg1: i32) -> (i32, i32, i32) {
    %c0_i32 = arith.constant 0 : i32
    %c0_i32_0 = arith.constant 0 : i32
    return %arg0, %arg1, %c0_i32 : i32, i32, i32
  }
}

</mosaic_0001>

<bundles_post_ra>
// kernel: tpu_custom_call.1
= control target key start
LH: loop header
LB: loop body
LE: loop exit
PB: predicated region body
PF: predicated region fallthrough
CT: control target
= control target key end

     0   :  { %s3410_s0 = inlined_call_operand.hbm [shape: f32[2,1,16], index: 0, kind: input, shape index: {}]   ;;  %s3411_s1 = inlined_call_operand.vmem [shape: f32[2,16,32], index: 1, kind: input, shape index: {}]   ;;  %s3412_s2 = inlined_call_operand.vmem [shape: f32[2,16,32], index: 2, kind: input, shape index: {}]   ;;  %s3413_s3 = inlined_call_operand.vmem [shape: f32[1,32], index: 3, kind: input, shape index: {}]   ;;  %s3414_s4 = inlined_call_operand.vmem [shape: f32[1,32], index: 4, kind: input, shape index: {}]   ;;  %s3415_s5 = inlined_call_operand.vmem [shape: bf16[32,32], index: 5, kind: input, shape index: {}]   ;;  %s3416_s6 = inlined_call_operand.hbm [shape: bf16[32,32], index: 6, kind: input, shape index: {}]   ;;  %s3417_s7 = inlined_call_operand.hbm [shape: bf16[32,32], index: 7, kind: input, shape index: {}]   ;;  %s3418_s8 = inlined_call_operand.hbm [shape: bf16[4,8,32], index: 8, kind: input, shape index: {}]   ;;  %s3419_s9 = inlined_call_operand.hbm [shape: f32[1,32], index: 9, kind: input, shape index: {}]   ;;  %s3420_s10 = inlined_call_operand.vmem [shape: f32[1,32], index: 10, kind: input, shape index: {}]   ;;  %s3421_s11 = inlined_call_operand.vmem [shape: f32[1,32], index: 11, kind: input, shape index: {}]   ;;  %s3422_s12 = inlined_call_operand.vmem [shape: bf16[32,128], index: 12, kind: input, shape index: {}]   ;;  %s3423_s13 = inlined_call_operand.vmem [shape: f32[1,128], index: 13, kind: input, shape index: {}]   ;;  %s3424_s14 = inlined_call_operand.vmem [shape: bf16[128,32], index: 14, kind: input, shape index: {}]   ;;  %s3425_s15 = inlined_call_operand.vmem [shape: f32[1,32], index: 15, kind: input, shape index: {}]   ;;  %s3426_s16 = inlined_call_operand.hbm [shape: f32[2,16,32], index: 16, kind: output, shape index: {}]  }
   0x1   :  { %3437 = sst [smem:[#allocation19_spill]] %s3410_s0 }
   0x2   :  { %3438 = sst [smem:[#allocation20_spill]] %s3411_s1 }
   0x3   :  { %3439 = sst [smem:[#allocation21_spill]] %s3412_s2 }
   0x4   :  { %3440 = sst [smem:[#allocation22_spill]] %s3415_s5 }
   0x5   :  { %3441 = sst [smem:[#allocation23_spill]] %s3416_s6 }
   0x6   :  { %3442 = sst [smem:[#allocation24_spill]] %s3420_s10 }
   0x7   :  { %3443 = sst [smem:[#allocation25_spill]] %s3421_s11 }
   0x8   :  { %3444 = sst [smem:[#allocation26_spill]] %s3422_s12 }
   0x9   :  { %3445 = sst [smem:[#allocation27_spill]] %s3423_s13 }
   0xa   :  { %3446 = sst [smem:[#allocation28_spill]] %s3424_s14 }
   0xb   :  { %3447 = sst [smem:[#allocation29_spill]] %s3425_s15 }
   0xc   :  { %3448 = sst [smem:[#allocation30_spill]] %s3426_s16 }
   0xd   :  { %21 = vsyncpa [#allocation6], 0 }
   0xe   :  { %23 = vsyncpa [#allocation6 + $0x1], 0 }
   0xf   :  { %24 = vsyncpa [#allocation9], 0 }
  0x10   :  { %25 = vsyncpa [#allocation12], 0 }
  0x11   :  { %26 = vsyncpa [#allocation7], 0 }
  0x12   :  { %28 = vsyncpa [#allocation7 + $0x1], 0  ;;  %s2840_s21 = smov 0   ;;  %s2842_s22 = smov 0  }
  0x13   :  { %s2844_s23 = smov 0   ;;  %s2846_s24 = smov 0  }
  0x14   :  { %s2848_s25 = smov 0   ;;  %s2850_s26 = smov 0  }
  0x15 LB: > { %s3428_s27 = sadd.s32 4294967295, %s2737_s26   ;;  %p2098_p0 = scmp.ge.s32.totalorder %s2737_s26, 1  ;;  %s2737_s26 = sphi %s2850_s26, %s34_s26   ;;  %s2733_s25 = sphi %s2848_s25, %s3481_s25   ;;  %s2729_s24 = sphi %s2846_s24, %s3480_s24   ;;  %s2725_s23 = sphi %s2844_s23, %s3479_s23   ;;  %s2721_s22 = sphi %s2842_s22, %s3478_s22   ;;  %s2717_s21 = sphi %s2840_s21, %s3477_s21  }
  0x16   : > { %p2874_p1 = scmp.eq.s32.totalorder %s3428_s27, 0  ;;  %p432_p2 = scmp.lt.s32.totalorder %s2737_s26, 3 }
  0x17   : > { %s2739_s30 = smov [#allocation8]   ;;  %s2740_s18 = smov [#allocation11]  }
  0x18   : > { %s3449_s28 = scalar_select %p2874_p1, 1, 0 }
  0x19   : > { %p2879_p3 = pnand %p2098_p0, %p432_p2  ;;  %s453_s0 = sshll.u32 %s2739_s30, 4  ;;  %s2883_s0 = int_to_ptr.vmem [resolvable:$true] %s453_s0 }
  0x1a   : > { %s479_s19 = sshll.u32 %s2740_s18, 4  ;;  %s2741_s20 = smov [#allocation10]   ;;  %s2894_s19 = int_to_ptr.vmem [resolvable:$true] %s479_s19 }
  0x1b   : > { %s3450_s29 = scalar_select %p2879_p3, 1, 0 }
  0x1c   : > { %p2352_p4 = pneg %p2879_p3  ;;  %s2896_s27 = sshll.u32 %s2741_s20, 4  ;;  %s467_s27 = int_to_ptr.vmem [resolvable:$true] %s2896_s27 }
  0x1d   : > { %s3452_s6 = sld [smem:[#allocation23_spill]] }
  0x1e   : > { %p2890_p6 = pnand %p2352_p4, %p2874_p1 }
  0x20   : > { %p2906_p8 = pneg %p2890_p6 }
  0x23   : > { %s2505_s15 = scalar_lea.hbm %s3452_s6, 256 }
  0x24   : > { %p2506_p7 = scmp.ne.s32.totalorder %s3452_s6, %s2505_s15  ;;  %p2512_p11 = scmp.lt.u32.totalorder %s2505_s15, %s3452_s6 }
  0x26   : > { %p2508_p9 = pnand %p2906_p8, %p2506_p7 }
  0x28   : > { %p2509_p10 = pneg %p2508_p9 }
  0x2a   : > { %p2514_p12 = pnand %p2512_p11, %p2509_p10 }
  0x2c   : > { %2517 = shalt.err (!%p2514_p12)
}
  0x2d   : > { %s2518_s13 = scalar_lea.vmem %s2883_s0, 256  ;;  %p2526_p4 = scmp.lt.s32.totalorder %s2883_s0, %s2883_s0 }
  0x2e   : > { %p2519_p13 = scmp.ne.s32.totalorder %s2883_s0, %s2518_s13  ;;  %p2527_p5 = scmp.lt.s32.totalorder %s2518_s13, %s2518_s13 }
  0x30   : > { %p2521_p0 = pnand %p2519_p13, %p2906_p8  ;;  %p2528_p7 = por %p2527_p5, %p2526_p4 }
  0x32   : > { %p2522_p2 = pneg %p2521_p0 }
  0x34   : > { %p2529_p9 = pnand %p2528_p7, %p2522_p2 }
  0x36   : > { %2532 = shalt.err (!%p2529_p9)
}
  0x37   : > { %s2742_s14 = smov 64   ;;  %s2743_s15 = smov 4  }
  0x38   : > { %2355 = dma.hbm_to_vmem [thread:$0]  (!%p2890_p6), %s3452_s6, 256, %s2883_s0, [#allocation9], %s2742_s14, %s2742_s14, %s2743_s15  }
  0x39   : > { %s2533_s13 = scalar_lea.hbm %s3418_s8, 256 }
  0x3a   : > { %p2534_p5 = scmp.ne.s32.totalorder %s3418_s8, %s2533_s13  ;;  %p2540_p12 = scmp.lt.u32.totalorder %s2533_s13, %s3418_s8 }
  0x3c   : > { %p2536_p10 = pnand %p2534_p5, %p2906_p8 }
  0x3e   : > { %p2537_p11 = pneg %p2536_p10 }
  0x40   : > { %p2542_p13 = pnand %p2540_p12, %p2537_p11 }
  0x42   : > { %2545 = shalt.err (!%p2542_p13)
}
  0x43   : > { %s2546_s0 = scalar_lea.vmem %s2894_s19, 256  ;;  %p2554_p7 = scmp.lt.s32.totalorder %s2894_s19, %s2894_s19 }
  0x44   : > { %p2547_p0 = scmp.ne.s32.totalorder %s2894_s19, %s2546_s0  ;;  %p2555_p9 = scmp.lt.s32.totalorder %s2546_s0, %s2546_s0 }
  0x46   : > { %p2549_p2 = pnand %p2547_p0, %p2906_p8  ;;  %p2556_p5 = por %p2555_p9, %p2554_p7 }
  0x48   : > { %p2550_p4 = pneg %p2549_p2 }
  0x4a   : > { %p2557_p10 = pnand %p2556_p5, %p2550_p4 }
  0x4c   : > { %2560 = shalt.err (!%p2557_p10)
}
  0x4d   : > { %2361 = dma.hbm_to_vmem [thread:$0]  (!%p2890_p6), %s3418_s8, 256, %s2894_s19, [#allocation12], %s2742_s14, %s2742_s14, %s2743_s15  }
  0x4e   : > { %s2561_s16 = scalar_lea.hbm %s3417_s7, 256 }
  0x4f   : > { %p2562_p11 = scmp.ne.s32.totalorder %s3417_s7, %s2561_s16  ;;  %p2568_p0 = scmp.lt.u32.totalorder %s2561_s16, %s3417_s7 }
  0x51   : > { %p2564_p12 = pnand %p2562_p11, %p2906_p8 }
  0x53   : > { %p2565_p13 = pneg %p2564_p12 }
  0x55   : > { %p2570_p2 = pnand %p2568_p0, %p2565_p13 }
  0x57   : > { %2573 = shalt.err (!%p2570_p2)
}
  0x58   : > { %s2574_s0 = scalar_lea.vmem %s467_s27, 256  ;;  %p2582_p5 = scmp.lt.s32.totalorder %s467_s27, %s467_s27 }
  0x59   : > { %p2575_p4 = scmp.ne.s32.totalorder %s467_s27, %s2574_s0  ;;  %p2583_p10 = scmp.lt.s32.totalorder %s2574_s0, %s2574_s0 }
  0x5b   : > { %p2577_p7 = pnand %p2575_p4, %p2906_p8  ;;  %p2584_p3 = por %p2583_p10, %p2582_p5 }
  0x5d   : > { %p2578_p9 = pneg %p2577_p7 }
  0x5f   : > { %p2585_p1 = pnand %p2584_p3, %p2578_p9 }
  0x61   : > { %2588 = shalt.err (!%p2585_p1)
}
  0x62   : > { %2358 = dma.hbm_to_vmem [thread:$0]  (!%p2890_p6), %s3417_s7, 256, %s467_s27, [#allocation9], %s2742_s14, %s2742_s14, %s2743_s15  }
  0x63   : > { %s2744_s5 = smov [#allocation13]   ;;  %s2589_s30 = scalar_lea.hbm %s3419_s9, 16 }
  0x64   : > { %s493_s10 = sshll.u32 %s2744_s5, 4  ;;  %p2590_p1 = scmp.ne.s32.totalorder %s3419_s9, %s2589_s30  ;;  %s494_s10 = int_to_ptr.vmem [resolvable:$true] %s493_s10 }
  0x65   : > { %p2596_p12 = scmp.lt.u32.totalorder %s2589_s30, %s3419_s9 }
  0x66   : > { %p2592_p3 = pnand %p2590_p1, %p2906_p8 }
  0x68   : > { %p2593_p11 = pneg %p2592_p3 }
  0x6a   : > { %p2598_p13 = pnand %p2596_p12, %p2593_p11 }
  0x6c   : > { %2601 = shalt.err (!%p2598_p13)
}
  0x6d   : > { %s2602_s27 = scalar_lea.vmem %s494_s10, 16  ;;  %s2609_s14 = scalar_lea.vmem %s494_s10, 32 }
  0x6e   : > { %p2603_p0 = scmp.ne.s32.totalorder %s494_s10, %s2602_s27  ;;  %p2610_p7 = scmp.lt.s32.totalorder %s494_s10, %s494_s10 }
  0x6f   : > { %p2611_p9 = scmp.lt.s32.totalorder %s2609_s14, %s2602_s27 }
  0x70   : > { %p2605_p2 = pnand %p2603_p0, %p2906_p8 }
  0x71   : > { %p2612_p5 = por %p2611_p9, %p2610_p7 }
  0x72   : > { %p2606_p4 = pneg %p2605_p2 }
  0x74   : > { %p2613_p10 = pnand %p2612_p5, %p2606_p4 }
  0x76   : > { %2616 = shalt.err (!%p2613_p10)
}
  0x77   : > { %2364 = dma.hbm_to_vmem [thread:$0]  (!%p2890_p6), %s3419_s9, 16, %s494_s10, [#allocation12]  }
  0x78   : > { %s2097_s11 = sadd.s32 4294967294, %s2737_s26   ;;  %s46_s1 = sadd.s32 1, %s2733_s25 }
  0x79   : > { %p48_p8 = scmp.ge.s32.totalorder %s46_s1, 2  ;;  %s53_s17 = sadd.s32 1, %s2725_s23 }
  0x7a   : > { %p60_p1 = scmp.ne.s32.totalorder %s2725_s23, %s2721_s22  ;;  %p61_p3 = scmp.eq.s32.totalorder %s2737_s26, 0 }
  0x7b   : > { %s3483_s1 = smov (%p48_p8, %s46_s1), 0  ;;  %p66_p12 = scmp.ne.s32.totalorder %s2721_s22, %s2717_s21 }
  0x7c   : > { %p3004_p11 = por %p61_p3, %p60_p1  ;;  %s50_s10 = ssub.s32 %s2733_s25, %s3483_s1 }
  0x7d   : > { %s3455_s12 = sadd.s32 4294967295, %s2737_s26   ;;  %p51_p13 = scmp.eq.s32.totalorder %s50_s10, 0 }
  0x7e   : > { %p419_p6 = scmp.eq.s32.totalorder %s3455_s12, 1  ;;  %p3456_p0 = scmp.ne.s32.totalorder %s3449_s28, 0 }
  0x7f   : > { %p425_p7 = scmp.eq.s32.totalorder %s2097_s11, 1  ;;  %p2377_p5 = scmp.lt.s32.totalorder %s2737_s26, 2 }
  0x80   : > { %p3016_p2 = por %p3456_p0, %p66_p12  ;;  %p3020_p4 = por %p419_p6, %p60_p1 }
  0x81   : > { %s3025_s18 = scalar_select %p51_p13, %s2725_s23, %s53_s17  }
  0x82   : > { %s3458_s30 = scalar_select %p3020_p4, 1, 0 }
  0x83   : > { %p3027_p9 = por %p425_p7, %p66_p12  ;;  %s522_s13 = sand.u32 1, %s2725_s23  }
  0x84   : > { %s2104_s0 = sshll.u32 %s2733_s25, 4  ;;  %s3460_s15 = sld [smem:[#allocation19_spill]] }
  0x85   : > { %s3459_s20 = scalar_select %p3027_p9, 1, 0 }
  0x86   : > { %s525_s10 = scalar_lea.vmem [#allocation5], %s522_s13  ;;  %p3043_p10 = pnand %p2377_p5, %p3004_p11 }
  0x87   : > { %s532_s11 = sshll.u32 %s525_s10, 4  ;;  %s523_s12 = scalar_lea.sflag [#allocation6], %s522_s13  ;;  %s3039_s11 = int_to_ptr.vmem [resolvable:$true] %s532_s11 }
  0x88   : > { %p2619_p1 = pneg %p3043_p10 }
  0x8a   : > { %s3037_s19 = scalar_lea.hbm %s3460_s15, %s2104_s0  ;;  %s2622_s14 = scalar_lea.hbm %s3460_s15, 32 }
  0x8b   : > { %s2617_s6 = scalar_lea.hbm %s3037_s19, 16  ;;  %p2623_p11 = scmp.lt.u32.totalorder %s3037_s19, %s3460_s15 }
  0x8c   : > { %p2618_p8 = scmp.ne.s32.totalorder %s3037_s19, %s2617_s6  ;;  %p2624_p6 = scmp.lt.u32.totalorder %s2622_s14, %s2617_s6 }
  0x8d   : > { %p2626_p0 = scmp.lt.u32.totalorder %s2617_s6, %s3037_s19 }
  0x8e   : > { %p2620_p3 = pnand %p2619_p1, %p2618_p8  ;;  %p2625_p13 = por %p2624_p6, %p2623_p11 }
  0x90   : > { %p2621_p12 = pneg %p2620_p3  ;;  %p2627_p7 = por %p2626_p0, %p2625_p13 }
  0x92   : > { %p2628_p5 = pnand %p2627_p7, %p2621_p12 }
  0x94   : > { %2631 = shalt.err (!%p2628_p5)
}
  0x95   : > { %s2632_s13 = scalar_lea.vmem %s3039_s11, 16  ;;  %s2745_s0 = smov [#allocation5]  }
  0x96   : > { %p2633_p8 = scmp.ne.s32.totalorder %s3039_s11, %s2632_s13  ;;  %s2637_s27 = sshll.u32 %s2745_s0, 4  ;;  %s2638_s27 = int_to_ptr.vmem [resolvable:$false] %s2637_s27 }
  0x97   : > { %s2639_s5 = scalar_lea.vmem %s2638_s27, 32  ;;  %p2640_p4 = scmp.lt.s32.totalorder %s3039_s11, %s2638_s27 }
  0x98   : > { %p2635_p3 = pnand %p2633_p8, %p2619_p1  ;;  %p2641_p11 = scmp.lt.s32.totalorder %s2639_s5, %s2632_s13 }
  0x9a   : > { %p2636_p9 = pneg %p2635_p3  ;;  %p2642_p6 = por %p2641_p11, %p2640_p4 }
  0x9c   : > { %p2643_p13 = pnand %p2642_p6, %p2636_p9 }
  0x9e   : > { %2646 = shalt.err (!%p2643_p13)
}
  0x9f   : > { %2368 = dma.hbm_to_vmem [thread:$0]  (!%p3043_p10), %s3037_s19, 16, %s3039_s11, %s523_s12  }
  0xa0   : > { %p3462_p12 = scmp.ne.s32.totalorder %s3450_s29, 0 }
  0xa1   : > { %s3075_s6 = sand.u32 (!%p3462_p12), 1, %s2721_s22  }
  0xa2   : > { %562 = sbr.rel (%p3462_p12) target bundleno = 4132 (0x1024), region = 84  ;;  %s565_s14 = scalar_lea.sflag (!%p3462_p12), [#allocation6], %s3075_s6 }
  0xa3   : > { %s567_s10 = scalar_lea.vmem (!%p3462_p12), [#allocation5], %s3075_s6 }
  0xa9   : > { %2700 = dma.done.wait (%p3016_p2), %s565_s14, 16  }
  0xaa   : > { %2702 = vsyncadd (%p3016_p2), %s565_s14, 4294967280  ;;  %p3463_p4 = scmp.ne.s32.totalorder %s3449_s28, 0 }
  0xac   : > { %2704 = dma.done.wait (%p3463_p4), [#allocation9], 512  }
  0xad   : > { %2706 = vsyncadd (%p3463_p4), [#allocation9], 4294966784 }
  0xae   : > { %2708 = dma.done.wait (%p3463_p4), [#allocation12], 272  }
  0xaf   : > { %2710 = vsyncadd (%p3463_p4), [#allocation12], 4294967024  ;;  %p646_p9 = scmp.lt.s32.totalorder %s2729_s24, 1  ;;  %s3464_s2 = sld [smem:[#allocation21_spill]]  ;;  %vm670_vm0 = vcmask 261120   ;;  %v2445_v14 = vld [vmem:[#allocation8] sm:$0xff]   ;;  %v940_v57 = vlaneseq }
  0xb0   : > { %v2746_v15 = vmov 0.0   ;;  %v2446_v16 = vld [vmem:[#allocation8 + $0x8] sm:$0xff]   ;;  %vm2747_vm1 = vmmov 0   ;;  %v2115_v25 = vld [vmem:[%s3413_s3] ss:$0 sm:$0xff]  ;;  %v2448_v35 = vld [vmem:[#allocation10 + $0x8] sm:$0xff]  }
  0xb1   : > { %s3093_s29 = scalar_select %p646_p9, %s2729_s24, 1  ;;  %2208 = vmatprep.subr.bf16.mxu1 %v2746_v15  ;;  %2238 = vmatprep.subr.bf16.mxu0 %v2746_v15  ;;  %v2116_v29 = vld [vmem:[%s3414_s4] ss:$0 sm:$0xff]  ;;  %vm835_vm2 = vcmask 64512   ;;  %v941_v58 = vand.u32 127, %v940_v57  ;;  %vm1018_vm4 = vcmask 130048  }
  0xb2   : > { %2209 = vmatpush3.bf16.msra.mxu1 %v2445_v14  ;;  %2212 = vmatprep.mubr.msk.bf16.mxu1 %vm2747_vm1, %v2746_v15  ;;  %v2447_v33 = vld [vmem:[#allocation10] sm:$0xff]   ;;  %s3465_s14 = sld [smem:[#allocation22_spill]]  ;;  %v2748_v59 = vmov -1e+30   ;;  %vm1097_vm7 = vcmask 1043456   ;;  %s2751_s28 = smov 104  }
  0xb3   : > { %s2160_s16 = sshll.u32 %s3093_s29, 4  ;;  %2210 = vmatprep.subr.bf16.mxu1 %v2746_v15  ;;  %2240 = vmatprep.mubr.msk.bf16.mxu0 %vm2747_vm1, %v2746_v15  ;;  %vm942_vm3 = vcmp.lt.s32.totalorder %v941_v58, 8  ;;  %s3466_s0 = sld [smem:[#allocation20_spill]] }
  0xb4   : > { %v3156_v60 = vsel %vm942_vm3, 0.0, %v2748_v59  ;;  %s3467_s5 = sld [smem:[#allocation26_spill]]  ;;  %s3471_s13 = sld [smem:[#allocation27_spill]] }
  0xb5   : > { %s659_s17 = scalar_lea.vmem %s3464_s2, %s2160_s16  ;;  %s3472_s19 = sld [smem:[#allocation29_spill]] }
  0xb6   : > { %v668_v0 = vld [vmem:[%s659_s17] sm:$0xff]  ;;  %v669_v1 = vld [vmem:[%s659_s17 + $0x8] sm:$0xff]  ;;  %2211 = vmatpush3.bf16.msra.mxu1 %v2446_v16  ;;  %s2749_s17 = smov 120   ;;  %s2162_s11 = sshll.u32 %s2729_s24, 8 }
  0xb7   : > { %v671_v2 = vsel %vm670_vm0, %v668_v0, 0.0  ;;  %v674_v3 = vsel %vm670_vm0, %v669_v1, 0.0  ;;  %2216 = vmatprep.subr.bf16.mxu1 %v2746_v15  ;;  %s1930_s24 = scalar_lea.sflag [#allocation7], %s3075_s6  ;;  %p3474_p10 = scmp.ne.s32.totalorder %s3458_s30, 0 }
  0xb8   : > { %672 = vadd.xlane.f32.xlu0 %v671_v2  ;;  %v2449_v36 = vld [vmem:[%s3465_s14] sm:$0xff]   ;;  %v2450_v37 = vld [vmem:[%s3465_s14 + $0x8] sm:$0xff]  }
  0xb9   : > { %s653_s27 = scalar_lea.vmem %s3466_s0, %s2160_s16  ;;  %s3469_s0 = sld [smem:[#allocation25_spill]] }
  0xba   : > { %s3470_s16 = sld [smem:[#allocation28_spill]] }
  0xbc   : > { %675 = vadd.xlane.f32.xlu0 %v674_v3 }
 0x145   : > { %v673_v4 = vpop.xlane.xlu0 %672 }
 0x146   : > { %v678_v5 = vmul.f32 0.03125, %v673_v4 }
 0x148   : > { %v680_v6 = vsub.f32 %v668_v0, %v678_v5 }
 0x149   : > { %v676_v7 = vpop.xlane.xlu0 %675 }
 0x14a   : > { %v679_v8 = vmul.f32 0.03125, %v676_v7  ;;  %v682_v9 = vmul.f32 %v680_v6, %v680_v6 }
 0x14c   : > { %v681_v10 = vsub.f32 %v669_v1, %v679_v8  ;;  %v684_v11 = vsel %vm670_vm0, %v682_v9, 0.0 }
 0x14d   : > { %685 = vadd.xlane.f32.xlu1 %v684_v11 }
 0x14e   : > { %v683_v12 = vmul.f32 %v681_v10, %v681_v10 }
 0x150   : > { %v687_v13 = vsel %vm670_vm0, %v683_v12, 0.0 }
 0x151   : > { %688 = vadd.xlane.f32.xlu1 %v687_v13  ;;  %v2126_v13 = vld [vmem:[%s567_s10] ss:$0 sm:$0xff]  ;;  %s2750_s10 = smov 112  }
 0x1da   : > { %v686_v17 = vpop.xlane.xlu1 %685 }
 0x1db   : > { %v690_v18 = vmul.f32 0.03125, %v686_v17 }
 0x1dd   : > { %v692_v19 = vadd.f32 1e-05, %v690_v18 }
 0x1de   : > { %v689_v20 = vpop.xlane.xlu1 %688 }
 0x1df   : > { %2461 = vrsqrt.f32 %v692_v19  ;;  %v691_v21 = vmul.f32 0.03125, %v689_v20 }
 0x1e1   : > { %v693_v22 = vadd.f32 1e-05, %v691_v21 }
 0x1e3   : > { %2463 = vrsqrt.f32 %v693_v22 }
 0x1e9   : > { %v2462_v23 = vpop.eup %2461 }
 0x1ea   : > { %v696_v24 = vmul.f32 %v2462_v23, %v680_v6 }
 0x1ec   : > { %v704_v28 = vmul.f32 %v2115_v25, %v696_v24 }
 0x1ed   : > { %v2464_v26 = vpop.eup %2463 }
 0x1ee   : > { %v697_v27 = vmul.f32 %v2464_v26, %v681_v10  ;;  %v712_v31 = vadd.f32 %v2116_v29, %v704_v28  ;;  %v946_v10 = vshrl.u32 %v940_v57, 7 }
 0x1f0   : > { %v705_v30 = vmul.f32 %v2115_v25, %v697_v27  ;;  %v947_v12 = vadd.s32 8, %v946_v10  ;;  %vm951_vm5 = vcmp.eq.s32.totalorder %v946_v10, %v941_v58 }
 0x1f1   : > { %v3164_v14 = vsel %vm951_vm5, 1.0, %v2126_v13 }
 0x1f2   : > { %v713_v32 = vadd.f32 %v2116_v29, %v705_v30  ;;  %vm952_vm6 = vcmp.eq.s32.totalorder %v947_v12, %v941_v58 }
 0x1f3   : > { %v3166_v17 = vsel %vm952_vm6, 1.0, %v2126_v13 }
 0x1f4   : > { %v714_v34 = vpack.c.bf16 %v713_v32, %v712_v31 }
 0x1f6   : > { %715 = vst.msk [vmem:[#allocation2] sm:$0xff] %vm670_vm0, %v714_v34  ;;  %2213 = vmatmul.mubr.msk.bf16.vlgmr.msra.gmra.mrb[0].mxu1 %vm670_vm0, %v714_v34 }
 0x1f7   : > { %2217 = vmatpush3.bf16.msra.mxu1 %v2447_v33  ;;  %2220 = vmatprep.mubr.msk.bf16.mxu1 %vm2747_vm1, %v2746_v15 }
 0x1f8   : > { %2218 = vmatprep.subr.bf16.mxu1 %v2746_v15 }
 0x1fb   : > { %2219 = vmatpush3.bf16.msra.mxu1 %v2448_v35 }
 0x1fc   : > { %2224 = vmatprep.subr.bf16.mxu1 %v2746_v15 }
 0x1fd   : > { %v877_v38 = vld [vmem:[#allocation2] sm:$0xff] }
 0x1fe   : > { %2221 = vmatmul.mubr.msk.bf16.vlgmr.msra.gmra.mrb[4].mxu1 %vm670_vm0, %v714_v34 }
 0x1ff   : > { %2225 = vmatpush3.bf16.msra.mxu1 %v2449_v36  ;;  %2228 = vmatprep.mubr.msk.bf16.mxu1 %vm2747_vm1, %v2746_v15 }
 0x200   : > { %2226 = vmatprep.subr.bf16.mxu1 %v2746_v15 }
 0x203   : > { %2227 = vmatpush3.bf16.msra.mxu1 %v2450_v37 }
 0x204   : > { %2232 = vmatprep.subr.bf16.mxu1 %v2746_v15 }
 0x206   : > { %2229 = vmatmul.mubr.msk.bf16.vlgmr.msra.gmra.mrb[8].mxu1 %vm670_vm0, %v877_v38  ;;  %v1093_v38 = vld [vmem:[#allocation11] sm:$0xf] }
 0x207   : > { %2234 = vmatprep.mubr.msk.bf16.mxu1 %vm2747_vm1, %v2746_v15 }
 0x2c9   : > { %v769_v39 = vpop.f32.mrb[0].mxu1 }
 0x2ca   : > { %v2214_v40 = vpop.f32.mrb[1].mxu1 }
 0x2cb   : > { %v772_v41 = vpop.f32.mrb[2].mxu1 }
 0x2cc   : > { %v3139_v42 = vpack.c.bf16 %v772_v41, %v769_v39  ;;  %v2215_v43 = vpop.f32.mrb[3].mxu1  ;;  %v1099_v39 = vsel %vm1097_vm7, %v1093_v38, 0 }
 0x2ce   : > { %836 = vst.msk [vmem:[#allocation3] sm:$0xff] %vm835_vm2, %v3139_v42 }
 0x2d1   : > { %v827_v44 = vpop.f32.mrb[4].mxu1 }
 0x2d2   : > { %v2222_v45 = vpop.f32.mrb[5].mxu1 }
 0x2d3   : > { %v830_v46 = vpop.f32.mrb[6].mxu1 }
 0x2d4   : > { %v3143_v47 = vpack.c.bf16 %v830_v46, %v827_v44  ;;  %v2223_v48 = vpop.f32.mrb[7].mxu1 }
 0x2d5   : > { %v968_v49 = vld [vmem:[#allocation3] sm:$0xff] }
 0x2d6   : > { %837 = vst.msk [vmem:[#allocation4] sm:$0xff] %vm835_vm2, %v3143_v47  ;;  %v975_v50 = vsel %vm835_vm2, %v968_v49, 0 }
 0x2d7   : > { %2233 = vmatpush3.bf16.xpose.msra.mxu1 %v975_v50 }
 0x2d8   : > { %2244 = vmatprep.subr.bf16.mxu1 %v2746_v15 }
 0x2d9   : > { %v932_v51 = vpop.f32.mrb[8].mxu1 }
 0x2da   : > { %v2230_v52 = vpop.f32.mrb[9].mxu1 }
 0x2db   : > { %v935_v53 = vpop.f32.mrb[10].mxu1 }
 0x2dc   : > { %v3149_v54 = vpack.c.bf16 %v935_v53, %v932_v51  ;;  %v2231_v55 = vpop.f32.mrb[11].mxu1 }
 0x2dd   : > { %v969_v56 = vld [vmem:[#allocation4] sm:$0xff] }
 0x2de   : > { %2235 = vmatmul.mubr.msk.bf16.vlgmr.msra.gmra.mrb[12].mxu1 %vm835_vm2, %v3149_v54  ;;  %2239 = vmatpush3.bf16.msra.mxu0 %v969_v56 }
 0x2df   : > { %2250 = vmatprep.subr.bf16.mxu0 %v2746_v15  ;;  %2246 = vmatprep.mubr.msk.bf16.mxu1 %vm2747_vm1, %v2746_v15 }
 0x2e0   : > { %2245 = vmatpush3.bf16.msra.mxu1 %v1099_v39 }
 0x2e1   : > { %2256 = vmatprep.subr.bf16.mxu1 %v2746_v15 }
 0x3b1   : > { %v1011_v61 = vpop.f32.mrb[12].mxu1 }
 0x3b2   : > { %v1012_v62 = vadd.f32 %v1011_v61, %v3156_v60  ;;  %v2236_v63 = vpop.f32.mrb[13].mxu1 }
 0x3b3   : > { %v1014_v0 = vpop.f32.mrb[14].mxu1 }
 0x3b4   : > { %v1015_v1 = vadd.f32 %v1014_v0, %v3156_v60  ;;  %v2237_v2 = vpop.f32.mrb[15].mxu1  ;;  %v1019_v3 = vsel %vm1018_vm4, %v1012_v62, -inf }
 0x3b5   : > { %1020 = vmax.xlane.f32.xlu0 %v1019_v3 }
 0x3b6   : > { %v1022_v4 = vsel %vm1018_vm4, %v1015_v1, -inf }
 0x3b7   : > { %1023 = vmax.xlane.f32.xlu1 %v1022_v4 }
 0x442   : > { %v1021_v5 = vpop.xlane.xlu0 %1020 }
 0x443   : > { %v1025_v6 = vsub.f32 %v1012_v62, %v1021_v5 }
 0x444   : > { %v1024_v7 = vpop.xlane.xlu1 %1023 }
 0x445   : > { %v1027_v8 = vmul.f32 1.442695, %v1025_v6  ;;  %v1026_v9 = vsub.f32 %v1015_v1, %v1024_v7 }
 0x447   : > { %2465 = vpow2.f32 %v1027_v8  ;;  %v1029_v11 = vmul.f32 1.442695, %v1026_v9 }
 0x449   : > { %2467 = vpow2.f32 %v1029_v11 }
 0x451   : > { %v2466_v16 = vpop.eup %2465 }
 0x452   : > { %v1031_v18 = vmul.f32 %v2466_v16, %v3164_v14 }
 0x453   : > { %v2468_v19 = vpop.eup %2467 }
 0x454   : > { %v1035_v20 = vsel %vm1018_vm4, %v1031_v18, 0.0  ;;  %v1032_v21 = vmul.f32 %v2468_v19, %v3166_v17  ;;  %v1033_v29 = vadd.f32 1.25e-07, %v1031_v18 }
 0x455   : > { %1036 = vadd.xlane.f32.xlu0 %v1035_v20 }
 0x456   : > { %v1038_v22 = vsel %vm1018_vm4, %v1032_v21, 0.0  ;;  %v1034_v30 = vadd.f32 1.25e-07, %v1032_v21 }
 0x457   : > { %1039 = vadd.xlane.f32.xlu1 %v1038_v22 }
 0x468   : > { %1149 = vrot.lane.b32.xlu1 %v3149_v54, %s2749_s17 }
 0x46b   : > { %839 = vrot.lane.b32.xlu0 %v3139_v42, %s2749_s17 }
 0x4e2   : > { %v1037_v23 = vpop.xlane.xlu0 %1036 }
 0x4e3   : > { %v1041_v24 = vadd.f32 1e-06, %v1037_v23 }
 0x4e4   : > { %v1040_v25 = vpop.xlane.xlu1 %1039 }
 0x4e5   : > { %2469 = vrcp.f32 %v1041_v24  ;;  %v1042_v26 = vadd.f32 1e-06, %v1040_v25 }
 0x4e6   : > { %v840_v27 = vpop.permute.xlu0 %839 }
 0x4e7   : > { %2471 = vrcp.f32 %v1042_v26  ;;  %843 = vst.msk [vmem:[#allocation3 + $0x8] sm:$0xff] %vm835_vm2, %v840_v27 }
 0x4e8   : > { %v1150_v37 = vpop.permute.xlu1 %1149 }
 0x4ee   : > { %v1145_v34 = vld [vmem:[#allocation3 + $0x8] sm:$0xff] }
 0x4ef   : > { %v2470_v28 = vpop.eup %2469  ;;  %v1155_v36 = vsel %vm835_vm2, %v1145_v34, 0 }
 0x4f0   : > { %v1045_v32 = vmul.f32 %v2470_v28, %v1033_v29  ;;  %v1273_v29 = vld [vmem:[#allocation11 + $0x4] sm:$0xf] }
 0x4f1   : > { %v2472_v31 = vpop.eup %2471 }
 0x4f2   : > { %v1046_v33 = vmul.f32 %v2472_v31, %v1034_v30  ;;  %v1278_v30 = vsel %vm1097_vm7, %v1273_v29, 0 }
 0x4f4   : > { %v1047_v35 = vpack.c.bf16 %v1046_v33, %v1045_v32 }
 0x4f6   : > { %2241 = vmatmul.mubr.msk.bf16.vlgmr.msra.gmra.mrb[0].mxu0 %vm1018_vm4, %v1047_v35 }
 0x4f7   : > { %2251 = vmatpush3.bf16.xpose.msra.mxu0 %v1155_v36  ;;  %2252 = vmatprep.mubr.msk.bf16.mxu0 %vm2747_vm1, %v2746_v15 }
 0x4f8   : > { %2262 = vmatprep.subr.bf16.mxu0 %v2746_v15 }
 0x4fe   : > { %2253 = vmatmul.mubr.msk.bf16.vlgmr.msra.gmra.mrb[4].mxu0 %vm835_vm2, %v1150_v37 }
 0x4ff   : > { %2264 = vmatprep.mubr.msk.bf16.mxu0 %vm2747_vm1, %v2746_v15  ;;  %2263 = vmatpush3.bf16.msra.mxu0 %v1278_v30 }
 0x500   : > { %2274 = vmatprep.subr.bf16.mxu0 %v2746_v15 }
 0x5c9   : > { %v1085_v40 = vpop.f32.mrb[0].mxu0 }
 0x5ca   : > { %v2242_v41 = vpop.f32.mrb[1].mxu0 }
 0x5cb   : > { %v1088_v43 = vpop.f32.mrb[2].mxu0 }
 0x5cc   : > { %v1092_v44 = vpack.c.bf16 %v1088_v43, %v1085_v40  ;;  %v2243_v45 = vpop.f32.mrb[3].mxu0 }
 0x5ce   : > { %2247 = vmatmul.mubr.msk.bf16.vlgmr.msra.gmra.mrb[16].mxu1 %vm835_vm2, %v1092_v44 }
 0x5cf   : > { %2258 = vmatprep.mubr.msk.bf16.mxu1 %vm2747_vm1, %v2746_v15 }
 0x5d1   : > { %v1191_v46 = vpop.f32.mrb[4].mxu0 }
 0x5d2   : > { %v1192_v48 = vadd.f32 %v1191_v46, %v3156_v60  ;;  %v2254_v49 = vpop.f32.mrb[5].mxu0 }
 0x5d3   : > { %v1194_v50 = vpop.f32.mrb[6].mxu0 }
 0x5d4   : > { %v1195_v51 = vadd.f32 %v1194_v50, %v3156_v60  ;;  %v2255_v52 = vpop.f32.mrb[7].mxu0  ;;  %v1198_v53 = vsel %vm1018_vm4, %v1192_v48, -inf }
 0x5d5   : > { %1199 = vmax.xlane.f32.xlu1 %v1198_v53 }
 0x5d6   : > { %v1201_v55 = vsel %vm1018_vm4, %v1195_v51, -inf }
 0x5d7   : > { %1202 = vmax.xlane.f32.xlu0 %v1201_v55 }
 0x662   : > { %v1200_v56 = vpop.xlane.xlu1 %1199 }
 0x663   : > { %v1204_v57 = vsub.f32 %v1192_v48, %v1200_v56 }
 0x664   : > { %v1203_v58 = vpop.xlane.xlu0 %1202 }
 0x665   : > { %v1206_v59 = vmul.f32 1.442695, %v1204_v57  ;;  %v1205_v61 = vsub.f32 %v1195_v51, %v1203_v58 }
 0x667   : > { %2473 = vpow2.f32 %v1206_v59  ;;  %v1208_v62 = vmul.f32 1.442695, %v1205_v61  ;;  %v2127_v61 = vld [vmem:[#allocation13] ss:$0 sm:$0xff] }
 0x669   : > { %2475 = vpow2.f32 %v1208_v62 }
 0x671   : > { %v2474_v63 = vpop.eup %2473 }
 0x672   : > { %v1210_v0 = vmul.f32 %v2474_v63, %v3164_v14 }
 0x673   : > { %v2476_v1 = vpop.eup %2475 }
 0x674   : > { %v1214_v2 = vsel %vm1018_vm4, %v1210_v0, 0.0  ;;  %v1211_v3 = vmul.f32 %v2476_v1, %v3166_v17  ;;  %v1212_v20 = vadd.f32 1.25e-07, %v1210_v0 }
 0x675   : > { %1215 = vadd.xlane.f32.xlu0 %v1214_v2 }
 0x676   : > { %v1217_v4 = vsel %vm1018_vm4, %v1211_v3, 0.0  ;;  %v1213_v21 = vadd.f32 1.25e-07, %v1211_v3 }
 0x677   : > { %1218 = vadd.xlane.f32.xlu1 %v1217_v4 }
 0x688   : > { %850 = vrot.lane.b32.xlu1 %v3139_v42, %s2750_s10 }
 0x68b   : > { %845 = vrot.lane.b32.xlu0 %v3143_v47, %s2749_s17 }
 0x68c   : > { %1327 = vrot.lane.b32.xlu1 %v3149_v54, %s2750_s10 }
 0x6a1   : > { %v3204_v5 = vpop.f32.mrb[16].mxu1 }
 0x6a2   : > { %v2248_v6 = vpop.f32.mrb[17].mxu1  ;;  %v1142_v62 = vadd.f32 %v2127_v61, %v3204_v5 }
 0x6a3   : > { %v3206_v7 = vpop.f32.mrb[18].mxu1 }
 0x6a4   : > { %v2249_v8 = vpop.f32.mrb[19].mxu1  ;;  %v1143_v0 = vadd.f32 %v2127_v61, %v3206_v7 }
 0x702   : > { %v1216_v9 = vpop.xlane.xlu0 %1215 }
 0x703   : > { %v1220_v10 = vadd.f32 1e-06, %v1216_v9 }
 0x704   : > { %v1219_v11 = vpop.xlane.xlu1 %1218 }
 0x705   : > { %2477 = vrcp.f32 %v1220_v10  ;;  %v1221_v12 = vadd.f32 1e-06, %v1219_v11 }
 0x706   : > { %v846_v13 = vpop.permute.xlu0 %845 }
 0x707   : > { %2479 = vrcp.f32 %v1221_v12  ;;  %849 = vst.msk [vmem:[#allocation4 + $0x8] sm:$0xff] %vm835_vm2, %v846_v13 }
 0x708   : > { %v851_v16 = vpop.permute.xlu1 %850 }
 0x709   : > { %854 = vst.msk [vmem:[#allocation3 + $0x10] sm:$0xff] %vm835_vm2, %v851_v16 }
 0x70c   : > { %v1328_v28 = vpop.permute.xlu1 %1327 }
 0x70e   : > { %v1147_v18 = vld [vmem:[#allocation4 + $0x8] sm:$0xff] }
 0x70f   : > { %v2478_v19 = vpop.eup %2477  ;;  %2257 = vmatpush3.bf16.msra.mxu1 %v1147_v18 }
 0x710   : > { %2268 = vmatprep.subr.bf16.mxu1 %v2746_v15  ;;  %v1224_v23 = vmul.f32 %v2478_v19, %v1212_v20  ;;  %v1324_v26 = vld [vmem:[#allocation3 + $0x10] sm:$0xff] }
 0x711   : > { %v2480_v22 = vpop.eup %2479  ;;  %v1333_v27 = vsel %vm835_vm2, %v1324_v26, 0 }
 0x712   : > { %v1225_v24 = vmul.f32 %v2480_v22, %v1213_v21 }
 0x714   : > { %v1226_v25 = vpack.c.bf16 %v1225_v24, %v1224_v23  ;;  %v1451_v23 = vld [vmem:[#allocation11 + $0x8] sm:$0xf] }
 0x715   : > { %v1456_v24 = vsel %vm1097_vm7, %v1451_v23, 0 }
 0x716   : > { %2259 = vmatmul.mubr.msk.bf16.vlgmr.msra.gmra.mrb[20].mxu1 %vm1018_vm4, %v1226_v25 }
 0x717   : > { %2270 = vmatprep.mubr.msk.bf16.mxu1 %vm2747_vm1, %v2746_v15 }
 0x718   : > { %2269 = vmatpush3.bf16.xpose.msra.mxu1 %v1333_v27 }
 0x719   : > { %2280 = vmatprep.subr.bf16.mxu1 %v2746_v15 }
 0x71f   : > { %2271 = vmatmul.mubr.msk.bf16.vlgmr.msra.gmra.mrb[24].mxu1 %vm835_vm2, %v1328_v28 }
 0x720   : > { %2282 = vmatprep.mubr.msk.bf16.mxu1 %vm2747_vm1, %v2746_v15  ;;  %2281 = vmatpush3.bf16.msra.mxu1 %v1456_v24 }
 0x721   : > { %2292 = vmatprep.subr.bf16.mxu1 %v2746_v15 }
 0x7e9   : > { %v1264_v31 = vpop.f32.mrb[20].mxu1 }
 0x7ea   : > { %v2260_v32 = vpop.f32.mrb[21].mxu1 }
 0x7eb   : > { %v1267_v33 = vpop.f32.mrb[22].mxu1 }
 0x7ec   : > { %v1271_v34 = vpack.c.bf16 %v1267_v33, %v1264_v31  ;;  %v2261_v35 = vpop.f32.mrb[23].mxu1 }
 0x7ee   : > { %2265 = vmatmul.mubr.msk.bf16.vlgmr.msra.gmra.mrb[8].mxu0 %vm835_vm2, %v1271_v34 }
 0x7ef   : > { %2276 = vmatprep.mubr.msk.bf16.mxu0 %vm2747_vm1, %v2746_v15 }
 0x7f2   : > { %v1369_v36 = vpop.f32.mrb[24].mxu1 }
 0x7f3   : > { %v1370_v37 = vadd.f32 %v1369_v36, %v3156_v60  ;;  %v2272_v38 = vpop.f32.mrb[25].mxu1 }
 0x7f4   : > { %v1372_v39 = vpop.f32.mrb[26].mxu1 }
 0x7f5   : > { %v1373_v40 = vadd.f32 %v1372_v39, %v3156_v60  ;;  %v2273_v41 = vpop.f32.mrb[27].mxu1  ;;  %v1376_v43 = vsel %vm1018_vm4, %v1370_v37, -inf }
 0x7f6   : > { %1377 = vmax.xlane.f32.xlu1 %v1376_v43 }
 0x7f7   : > { %v1379_v44 = vsel %vm1018_vm4, %v1373_v40, -inf }
 0x7f8   : > { %1380 = vmax.xlane.f32.xlu0 %v1379_v44 }
 0x807   : > { %855 = vrot.lane.b32.xlu1 %v3143_v47, %s2750_s10 }
 0x80b   : > { %1505 = vrot.lane.b32.xlu1 %v3149_v54, %s2751_s28 }
 0x883   : > { %v1378_v45 = vpop.xlane.xlu1 %1377 }
 0x884   : > { %v1382_v46 = vsub.f32 %v1370_v37, %v1378_v45 }
 0x885   : > { %v1381_v48 = vpop.xlane.xlu0 %1380 }
 0x886   : > { %v1384_v49 = vmul.f32 1.442695, %v1382_v46  ;;  %v1383_v50 = vsub.f32 %v1373_v40, %v1381_v48 }
 0x887   : > { %v856_v51 = vpop.permute.xlu1 %855 }
 0x888   : > { %2481 = vpow2.f32 %v1384_v49  ;;  %v1386_v52 = vmul.f32 1.442695, %v1383_v50  ;;  %859 = vst.msk [vmem:[#allocation4 + $0x10] sm:$0xff] %vm835_vm2, %v856_v51  ;;  %v1629_v51 = vld [vmem:[#allocation11 + $0xc] sm:$0xf] }
 0x88a   : > { %2483 = vpow2.f32 %v1386_v52  ;;  %v1634_v52 = vsel %vm1097_vm7, %v1629_v51, 0 }
 0x88b   : > { %v1506_v22 = vpop.permute.xlu1 %1505 }
 0x88f   : > { %v1326_v53 = vld [vmem:[#allocation4 + $0x10] sm:$0xff] }
 0x890   : > { %2275 = vmatpush3.bf16.msra.mxu0 %v1326_v53 }
 0x891   : > { %2286 = vmatprep.subr.bf16.mxu0 %v2746_v15 }
 0x892   : > { %v2482_v55 = vpop.eup %2481 }
 0x893   : > { %v1388_v56 = vmul.f32 %v2482_v55, %v3164_v14 }
 0x894   : > { %v2484_v57 = vpop.eup %2483 }
 0x895   : > { %v1392_v54 = vsel %vm1018_vm4, %v1388_v56, 0.0  ;;  %v1389_v58 = vmul.f32 %v2484_v57, %v3166_v17  ;;  %v1390_v12 = vadd.f32 1.25e-07, %v1388_v56 }
 0x896   : > { %1393 = vadd.xlane.f32.xlu0 %v1392_v54 }
 0x897   : > { %v1395_v59 = vsel %vm1018_vm4, %v1389_v58, 0.0  ;;  %v1391_v13 = vadd.f32 1.25e-07, %v1389_v58 }
 0x89a   : > { %1396 = vadd.xlane.f32.xlu0 %v1395_v59 }
 0x8b0   : > { %860 = vrot.lane.b32.xlu0 %v3139_v42, %s2751_s28 }
 0x8c1   : > { %v1314_v63 = vpop.f32.mrb[8].mxu0 }
 0x8c2   : > { %v3242_v1 = vadd.f32 %v1314_v63, %v1142_v62  ;;  %v2266_v2 = vpop.f32.mrb[9].mxu0 }
 0x8c3   : > { %v1317_v3 = vpop.f32.mrb[10].mxu0 }
 0x8c4   : > { %v3244_v4 = vadd.f32 %v1317_v3, %v1143_v0  ;;  %v2267_v6 = vpop.f32.mrb[11].mxu0 }
 0x923   : > { %v1394_v8 = vpop.xlane.xlu0 %1393 }
 0x924   : > { %v1398_v9 = vadd.f32 1e-06, %v1394_v8 }
 0x926   : > { %2485 = vrcp.f32 %v1398_v9 }
 0x927   : > { %v1397_v10 = vpop.xlane.xlu0 %1396 }
 0x928   : > { %v1399_v11 = vadd.f32 1e-06, %v1397_v10 }
 0x92a   : > { %2487 = vrcp.f32 %v1399_v11 }
 0x92b   : > { %v861_v42 = vpop.permute.xlu0 %860 }
 0x92c   : > { %864 = vst.msk [vmem:[#allocation3 + $0x18] sm:$0xff] %vm835_vm2, %v861_v42 }
 0x930   : > { %v2486_v5 = vpop.eup %2485 }
 0x931   : > { %v1402_v16 = vmul.f32 %v2486_v5, %v1390_v12  ;;  %v871_v5 = vld [vmem:[%s653_s27] sm:$0xff] }
 0x933   : > { %v1502_v19 = vld [vmem:[#allocation3 + $0x18] sm:$0xff] }
 0x934   : > { %v2488_v7 = vpop.eup %2487  ;;  %v1511_v21 = vsel %vm835_vm2, %v1502_v19, 0 }
 0x935   : > { %v1403_v18 = vmul.f32 %v2488_v7, %v1391_v13 }
 0x937   : > { %v1404_v20 = vpack.c.bf16 %v1403_v18, %v1402_v16  ;;  %v872_v16 = vld [vmem:[%s653_s27 + $0x8] sm:$0xff]  ;;  %s2752_s27 = smov [#allocation14]  }
 0x938   : > { %s2651_s29 = sshll.u32 %s2752_s27, 4  ;;  %s2652_s29 = int_to_ptr.vmem [resolvable:$false] %s2651_s29 }
 0x939   : > { %2277 = vmatmul.mubr.msk.bf16.vlgmr.msra.gmra.mrb[12].mxu0 %vm1018_vm4, %v1404_v20 }
 0x93a   : > { %2287 = vmatpush3.bf16.xpose.msra.mxu0 %v1511_v21  ;;  %2288 = vmatprep.mubr.msk.bf16.mxu0 %vm2747_vm1, %v2746_v15 }
 0x93b   : > { %2298 = vmatprep.subr.bf16.mxu0 %v2746_v15 }
 0x941   : > { %2289 = vmatmul.mubr.msk.bf16.vlgmr.msra.gmra.mrb[16].mxu0 %vm835_vm2, %v1506_v22 }
 0x942   : > { %2300 = vmatprep.mubr.msk.bf16.mxu0 %vm2747_vm1, %v2746_v15  ;;  %2299 = vmatpush3.bf16.msra.mxu0 %v1634_v52 }
 0x943   : > { %2312 = vmatprep.subr.bf16.mxu0 %v2746_v15 }
 0xa0c   : > { %v1442_v25 = vpop.f32.mrb[12].mxu0 }
 0xa0d   : > { %v2278_v26 = vpop.f32.mrb[13].mxu0 }
 0xa0e   : > { %v1445_v27 = vpop.f32.mrb[14].mxu0 }
 0xa0f   : > { %v1449_v28 = vpack.c.bf16 %v1445_v27, %v1442_v25  ;;  %v2279_v29 = vpop.f32.mrb[15].mxu0 }
 0xa11   : > { %2283 = vmatmul.mubr.msk.bf16.vlgmr.msra.gmra.mrb[28].mxu1 %vm835_vm2, %v1449_v28 }
 0xa12   : > { %2294 = vmatprep.mubr.msk.bf16.mxu1 %vm2747_vm1, %v2746_v15 }
 0xa14   : > { %v1547_v30 = vpop.f32.mrb[16].mxu0 }
 0xa15   : > { %v1548_v31 = vadd.f32 %v1547_v30, %v3156_v60  ;;  %v2290_v32 = vpop.f32.mrb[17].mxu0 }
 0xa16   : > { %v1550_v33 = vpop.f32.mrb[18].mxu0 }
 0xa17   : > { %v1551_v34 = vadd.f32 %v1550_v33, %v3156_v60  ;;  %v2291_v35 = vpop.f32.mrb[19].mxu0  ;;  %v1554_v36 = vsel %vm1018_vm4, %v1548_v31, -inf }
 0xa18   : > { %1555 = vmax.xlane.f32.xlu1 %v1554_v36  ;;  %v2451_v35 = vld [vmem:[%s3467_s5] sm:$0xff]   ;;  %v2452_v36 = vld [vmem:[%s3467_s5 + $0x8] sm:$0xff]  }
 0xa19   : > { %v1557_v37 = vsel %vm1018_vm4, %v1551_v34, -inf }
 0xa1a   : > { %1558 = vmax.xlane.f32.xlu0 %v1557_v37 }
 0xaa5   : > { %v1556_v38 = vpop.xlane.xlu1 %1555 }
 0xaa6   : > { %v1560_v39 = vsub.f32 %v1548_v31, %v1556_v38 }
 0xaa7   : > { %v1559_v40 = vpop.xlane.xlu0 %1558 }
 0xaa8   : > { %v1562_v41 = vmul.f32 1.442695, %v1560_v39  ;;  %v1561_v43 = vsub.f32 %v1551_v34, %v1559_v40 }
 0xaaa   : > { %2489 = vpow2.f32 %v1562_v41  ;;  %v1564_v44 = vmul.f32 1.442695, %v1561_v43 }
 0xaac   : > { %2491 = vpow2.f32 %v1564_v44 }
 0xab4   : > { %v2490_v45 = vpop.eup %2489 }
 0xab5   : > { %v1566_v46 = vmul.f32 %v2490_v45, %v3164_v14 }
 0xab6   : > { %v2492_v48 = vpop.eup %2491 }
 0xab7   : > { %v1570_v60 = vsel %vm1018_vm4, %v1566_v46, 0.0  ;;  %v1567_v49 = vmul.f32 %v2492_v48, %v3166_v17  ;;  %v1568_v0 = vadd.f32 1.25e-07, %v1566_v46 }
 0xab8   : > { %1571 = vadd.xlane.f32.xlu0 %v1570_v60 }
 0xab9   : > { %v1573_v50 = vsel %vm1018_vm4, %v1567_v49, 0.0 }
 0xaba   : > { %1574 = vadd.xlane.f32.xlu1 %v1573_v50  ;;  %v2141_v50 = vld [vmem:[%s3469_s0] ss:$0 sm:$0xff]  ;;  %s2110_s0 = sshll.u32 %s3075_s6, 4 }
 0xabb   : > { %s644_s17 = scalar_lea.vmem [#allocation14], %s2110_s0 }
 0xabc   : > { %s1945_s10 = sshll.u32 %s644_s17, 4  ;;  %s3358_s10 = int_to_ptr.vmem [resolvable:$true] %s1945_s10 }
 0xabd   : > { %s2647_s0 = scalar_lea.vmem %s3358_s10, 256  ;;  %p2654_p7 = scmp.lt.s32.totalorder %s3358_s10, %s2652_s29 }
 0xabe   : > { %p2648_p2 = scmp.ne.s32.totalorder %s3358_s10, %s2647_s0 }
 0xac0   : > { %p2649_p1 = pnand %p2648_p2, %p3474_p10 }
 0xac2   : > { %p2650_p0 = pneg %p2649_p1 }
 0xace   : > { %865 = vrot.lane.b32.xlu0 %v3143_v47, %s2751_s28  ;;  %s3468_s28 = sld [smem:[#allocation24_spill]] }
 0xad4   : > { %v2140_v46 = vld [vmem:[%s3468_s28] ss:$0 sm:$0xff] }
 0xae4   : > { %v1492_v53 = vpop.f32.mrb[28].mxu1 }
 0xae5   : > { %v1499_v14 = vadd.f32 %v1492_v53, %v3242_v1  ;;  %v2284_v55 = vpop.f32.mrb[29].mxu1  ;;  %v1569_v1 = vadd.f32 1.25e-07, %v1567_v49 }
 0xae6   : > { %v1495_v56 = vpop.f32.mrb[30].mxu1  ;;  %v2453_v55 = vld [vmem:[%s3470_s16] sm:$0xff]  }
 0xae7   : > { %v1500_v17 = vadd.f32 %v1495_v56, %v3244_v4  ;;  %v2285_v57 = vpop.f32.mrb[31].mxu1  ;;  %v2454_v56 = vld [vmem:[%s3470_s16 + $0x8] sm:$0xff]  }
 0xae8   : > { %v2456_v57 = vld [vmem:[%s3470_s16 + $0x18] sm:$0xff]  }
 0xb45   : > { %v1572_v54 = vpop.xlane.xlu0 %1571 }
 0xb46   : > { %v1576_v58 = vadd.f32 1e-06, %v1572_v54  ;;  %v2457_v54 = vld [vmem:[%s3470_s16 + $0x20] sm:$0xff]  }
 0xb47   : > { %v1575_v59 = vpop.xlane.xlu1 %1574 }
 0xb48   : > { %2493 = vrcp.f32 %v1576_v58  ;;  %v1577_v61 = vadd.f32 1e-06, %v1575_v59  ;;  %v2458_v58 = vld [vmem:[%s3470_s16 + $0x28] sm:$0xff]   ;;  %v2459_v59 = vld [vmem:[%s3470_s16 + $0x30] sm:$0xff]  }
 0xb49   : > { %v866_v47 = vpop.permute.xlu0 %865 }
 0xb4a   : > { %2495 = vrcp.f32 %v1577_v61  ;;  %869 = vst.msk [vmem:[#allocation4 + $0x18] sm:$0xff] %vm835_vm2, %v866_v47  ;;  %v2460_v61 = vld [vmem:[%s3470_s16 + $0x38] sm:$0xff]   ;;  %v2142_v47 = vld [vmem:[%s3471_s13] ss:$0 sm:$0xff]  ;;  %s3473_s13 = sld [smem:[#allocation30_spill]] }
 0xb50   : > { %s3356_s2 = scalar_lea.hbm %s3473_s13, %s2162_s11 }
 0xb51   : > { %v1504_v62 = vld [vmem:[#allocation4 + $0x18] sm:$0xff] }
 0xb52   : > { %v2494_v63 = vpop.eup %2493  ;;  %2293 = vmatpush3.bf16.msra.mxu1 %v1504_v62 }
 0xb53   : > { %2304 = vmatprep.subr.bf16.mxu1 %v2746_v15  ;;  %v1580_v3 = vmul.f32 %v2494_v63, %v1568_v0 }
 0xb54   : > { %v2496_v2 = vpop.eup %2495 }
 0xb55   : > { %v1581_v4 = vmul.f32 %v2496_v2, %v1569_v1 }
 0xb57   : > { %v1582_v6 = vpack.c.bf16 %v1581_v4, %v1580_v3 }
 0xb59   : > { %2295 = vmatmul.mubr.msk.bf16.vlgmr.msra.gmra.mrb[32].mxu1 %vm1018_vm4, %v1582_v6 }
 0xb5a   : > { %2308 = vmatprep.mubr.msk.bf16.mxu1 %vm2747_vm1, %v2746_v15  ;;  %2305 = vmatpush3.bf16.msra.mxu1 %v2451_v35 }
 0xb5b   : > { %2306 = vmatprep.subr.bf16.mxu1 %v2746_v15 }
 0xb5e   : > { %2307 = vmatpush3.bf16.msra.mxu1 %v2452_v36 }
 0xc2c   : > { %v1620_v8 = vpop.f32.mrb[32].mxu1 }
 0xc2d   : > { %v2296_v9 = vpop.f32.mrb[33].mxu1 }
 0xc2e   : > { %v1623_v10 = vpop.f32.mrb[34].mxu1 }
 0xc2f   : > { %v1627_v11 = vpack.c.bf16 %v1623_v10, %v1620_v8  ;;  %v2297_v42 = vpop.f32.mrb[35].mxu1 }
 0xc31   : > { %2301 = vmatmul.mubr.msk.bf16.vlgmr.msra.gmra.mrb[20].mxu0 %vm835_vm2, %v1627_v11 }
 0xc32   : > { %2328 = vmatprep.mubr.msk.bf16.mxu0 %vm2747_vm1, %v2746_v15  ;;  %2313 = vmatpush3.bf16.msra.mxu0 %v2453_v55 }
 0xc33   : > { %2314 = vmatprep.subr.bf16.mxu0 %v2746_v15 }
 0xc36   : > { %2315 = vmatpush3.bf16.msra.mxu0 %v2454_v56 }
 0xc37   : > { %2316 = vmatprep.subr.bf16.mxu0 %v2746_v15 }
 0xd04   : > { %v1670_v12 = vpop.f32.mrb[20].mxu0 }
 0xd05   : > { %v1677_v13 = vadd.f32 %v1670_v12, %v1499_v14  ;;  %v2302_v7 = vpop.f32.mrb[21].mxu0 }
 0xd06   : > { %v1673_v18 = vpop.f32.mrb[22].mxu0 }
 0xd07   : > { %v3287_v19 = vadd.f32 %v1677_v13, %v871_v5  ;;  %v1678_v20 = vadd.f32 %v1673_v18, %v1500_v17  ;;  %v2303_v21 = vpop.f32.mrb[23].mxu0  ;;  %v2455_v17 = vld [vmem:[%s3470_s16 + $0x10] sm:$0xff]  }
 0xd08   : > { %2317 = vmatpush3.bf16.msra.mxu0 %v2455_v17 }
 0xd09   : > { %v3289_v22 = vadd.f32 %v1678_v20, %v872_v16  ;;  %v1683_v23 = vsel %vm670_vm0, %v3287_v19, 0.0  ;;  %2318 = vmatprep.subr.bf16.mxu0 %v2746_v15 }
 0xd0a   : > { %1684 = vadd.xlane.f32.xlu1 %v1683_v23 }
 0xd0b   : > { %v1686_v24 = vsel %vm670_vm0, %v3289_v22, 0.0 }
 0xd0c   : > { %2319 = vmatpush3.bf16.msra.mxu0 %v2456_v57 }
 0xd0d   : > { %2320 = vmatprep.subr.bf16.mxu0 %v2746_v15 }
 0xd0e   : > { %1687 = vadd.xlane.f32.xlu1 %v1686_v24 }
 0xd10   : > { %2321 = vmatpush3.bf16.msra.mxu0 %v2457_v54 }
 0xd11   : > { %2322 = vmatprep.subr.bf16.mxu0 %v2746_v15 }
 0xd14   : > { %2323 = vmatpush3.bf16.msra.mxu0 %v2458_v58 }
 0xd15   : > { %2324 = vmatprep.subr.bf16.mxu0 %v2746_v15 }
 0xd18   : > { %2325 = vmatpush3.bf16.msra.mxu0 %v2459_v59 }
 0xd19   : > { %2326 = vmatprep.subr.bf16.mxu0 %v2746_v15 }
 0xd1c   : > { %2327 = vmatpush3.bf16.msra.mxu0 %v2460_v61 }
 0xd97   : > { %v1685_v25 = vpop.xlane.xlu1 %1684 }
 0xd98   : > { %v1690_v26 = vmul.f32 0.03125, %v1685_v25 }
 0xd9a   : > { %v1692_v27 = vsub.f32 %v3287_v19, %v1690_v26  ;;  %v2146_v26 = vld [vmem:[%s3472_s19] ss:$0 sm:$0xff]  ;;  %s2653_s19 = scalar_lea.vmem %s2652_s29, 512 }
 0xd9b   : > { %v1688_v28 = vpop.xlane.xlu1 %1687  ;;  %p2655_p5 = scmp.lt.s32.totalorder %s2653_s19, %s2647_s0 }
 0xd9c   : > { %v1691_v29 = vmul.f32 0.03125, %v1688_v28  ;;  %v1694_v30 = vmul.f32 %v1692_v27, %v1692_v27 }
 0xd9d   : > { %p2656_p8 = por %p2655_p5, %p2654_p7 }
 0xd9e   : > { %v1693_v31 = vsub.f32 %v3289_v22, %v1691_v29  ;;  %v1696_v32 = vsel %vm670_vm0, %v1694_v30, 0.0 }
 0xd9f   : > { %1697 = vadd.xlane.f32.xlu1 %v1696_v32  ;;  %p2657_p3 = pnand %p2656_p8, %p2650_p0 }
 0xda0   : > { %v1695_v33 = vmul.f32 %v1693_v31, %v1693_v31 }
 0xda2   : > { %v1699_v34 = vsel %vm670_vm0, %v1695_v33, 0.0 }
 0xda3   : > { %1700 = vadd.xlane.f32.xlu1 %v1699_v34 }
 0xe2c   : > { %v1698_v37 = vpop.xlane.xlu1 %1697 }
 0xe2d   : > { %v1702_v38 = vmul.f32 0.03125, %v1698_v37 }
 0xe2f   : > { %v1704_v39 = vadd.f32 1e-05, %v1702_v38 }
 0xe30   : > { %v1701_v40 = vpop.xlane.xlu1 %1700 }
 0xe31   : > { %2497 = vrsqrt.f32 %v1704_v39  ;;  %v1703_v41 = vmul.f32 0.03125, %v1701_v40 }
 0xe33   : > { %v1705_v43 = vadd.f32 1e-05, %v1703_v41 }
 0xe35   : > { %2499 = vrsqrt.f32 %v1705_v43 }
 0xe3b   : > { %v2498_v44 = vpop.eup %2497 }
 0xe3c   : > { %v1708_v45 = vmul.f32 %v2498_v44, %v1692_v27 }
 0xe3e   : > { %v1716_v60 = vmul.f32 %v2140_v46, %v1708_v45 }
 0xe3f   : > { %v2500_v48 = vpop.eup %2499 }
 0xe40   : > { %v1709_v49 = vmul.f32 %v2500_v48, %v1693_v31  ;;  %v1724_v52 = vadd.f32 %v2141_v50, %v1716_v60 }
 0xe42   : > { %v1717_v51 = vmul.f32 %v2140_v46, %v1709_v49 }
 0xe44   : > { %v1725_v53 = vadd.f32 %v2141_v50, %v1717_v51 }
 0xe46   : > { %v1726_v14 = vpack.c.bf16 %v1725_v53, %v1724_v52 }
 0xe48   : > { %2309 = vmatmul.mubr.msk.bf16.vlgmr.msra.gmra.mrb[36].mxu1 %vm670_vm0, %v1726_v14 }
 0xf1b   : > { %v1787_v62 = vpop.f32.mrb[36].mxu1 }
 0xf1c   : > { %v1788_v63 = vadd.f32 %v2142_v47, %v1787_v62  ;;  %v2310_v0 = vpop.f32.mrb[37].mxu1 }
 0xf1d   : > { %v1790_v1 = vpop.f32.mrb[38].mxu1 }
 0xf1e   : > { %v1796_v2 = vmul.f32 0.044715, %v1788_v63  ;;  %v1791_v3 = vadd.f32 %v2142_v47, %v1790_v1  ;;  %v2311_v4 = vpop.f32.mrb[39].mxu1  ;;  %v1794_v18 = vmul.f32 0.5, %v1788_v63 }
 0xf20   : > { %v1798_v6 = vmul.f32 %v1796_v2, %v1788_v63  ;;  %v1797_v8 = vmul.f32 0.044715, %v1791_v3  ;;  %v1795_v20 = vmul.f32 0.5, %v1791_v3 }
 0xf22   : > { %v1800_v9 = vmul.f32 %v1798_v6, %v1788_v63  ;;  %v1799_v10 = vmul.f32 %v1797_v8, %v1791_v3 }
 0xf24   : > { %v1802_v11 = vadd.f32 %v1800_v9, %v1788_v63  ;;  %v1801_v42 = vmul.f32 %v1799_v10, %v1791_v3 }
 0xf26   : > { %v1804_v15 = vmul.f32 0.7978846, %v1802_v11  ;;  %v1803_v5 = vadd.f32 %v1801_v42, %v1791_v3 }
 0xf28   : > { %2501 = vtanh.f32 %v1804_v15  ;;  %v1805_v12 = vmul.f32 0.7978846, %v1803_v5 }
 0xf2a   : > { %2503 = vtanh.f32 %v1805_v12 }
 0xf32   : > { %v2502_v13 = vpop.eup %2501 }
 0xf33   : > { %v1808_v7 = vadd.f32 1.0, %v2502_v13 }
 0xf34   : > { %v2504_v16 = vpop.eup %2503 }
 0xf35   : > { %v1809_v21 = vadd.f32 1.0, %v2504_v16  ;;  %v1810_v23 = vmul.f32 %v1808_v7, %v1794_v18 }
 0xf37   : > { %v1811_v24 = vmul.f32 %v1809_v21, %v1795_v20 }
 0xf39   : > { %v1812_v25 = vpack.c.bf16 %v1811_v24, %v1810_v23 }
 0xf3b   : > { %2329 = vmatmul.mubr.bf16.vlgmr.msra.gmra.mrb[24].mxu0 %v1812_v25 }
0x100e   : > { %v1918_v27 = vpop.f32.mrb[24].mxu0 }
0x100f   : > { %v1919_v28 = vadd.f32 %v2146_v26, %v1918_v27  ;;  %v2330_v29 = vpop.f32.mrb[25].mxu0 }
0x1010   : > { %v1921_v30 = vpop.f32.mrb[26].mxu0 }
0x1011   : > { %v1925_v31 = vadd.f32 %v1919_v28, %v3287_v19  ;;  %v1922_v32 = vadd.f32 %v2146_v26, %v1921_v30  ;;  %v2331_v33 = vpop.f32.mrb[27].mxu0 }
0x1013   : > { %1927 = vst.msk [vmem:[%s644_s17] sm:$0xff] %vm670_vm0, %v1925_v31  ;;  %v1926_v34 = vadd.f32 %v1922_v32, %v3289_v22 }
0x1015   : > { %1928 = vst.msk [vmem:[%s644_s17 + $0x8] sm:$0xff] %vm670_vm0, %v1926_v34 }
0x1016   : > { %2660 = shalt.err (!%p2657_p3)
}
0x1017   : > { %s2661_s11 = scalar_lea.hbm %s3356_s2, 256  ;;  %s2665_s12 = scalar_lea.hbm %s3473_s13, 512 }
0x1018   : > { %p2662_p11 = scmp.ne.s32.totalorder %s3356_s2, %s2661_s11  ;;  %p2666_p12 = scmp.lt.u32.totalorder %s3356_s2, %s3473_s13 }
0x1019   : > { %p2667_p4 = scmp.lt.u32.totalorder %s2665_s12, %s2661_s11  ;;  %p2669_p2 = scmp.lt.u32.totalorder %s2661_s11, %s3356_s2 }
0x101a   : > { %p2663_p6 = pnand %p2662_p11, %p3474_p10 }
0x101b   : > { %p2668_p9 = por %p2667_p4, %p2666_p12 }
0x101c   : > { %p2664_p13 = pneg %p2663_p6 }
0x101d   : > { %p2670_p1 = por %p2669_p2, %p2668_p9 }
0x101f   : > { %p2671_p0 = pnand %p2670_p1, %p2664_p13 }
0x1021   : > { %2674 = shalt.err (!%p2671_p0)
}
0x1022   : > { %s2753_s0 = smov 128   ;;  %s2754_s19 = smov 8  }
0x1023   : > { %2350 = dma.vmem_to_hbm [thread:$0]  (%p3474_p10), %s3358_s10, 256, %s3356_s2, %s1930_s24, %s2753_s0, %s2753_s0, %s2754_s19  }
0x1024 PF: > { %s1960_s17 = sand.u32 1, %s2717_s21   ;;  %p3475_p7 = scmp.ne.s32.totalorder %s3459_s20, 0 }
0x1025   : > { %p3476_p5 = scmp.ge.s32.totalorder %s2737_s26, 2  ;;  %s1961_s11 = scalar_lea.sflag [#allocation7], %s1960_s17 }
0x1027   : > { %p2370_p8 = pnand %p3476_p5, %p3475_p7 }
0x1029   : > { %2712 = dma.done.wait (!%p2370_p8), %s1961_s11, 256  }
0x102a   : > { %2714 = vsyncadd (!%p2370_p8), %s1961_s11, 4294967040  ;;  %s34_s26 = sadd.s32 1, %s2737_s26   ;;  %s3477_s21 = smov %s2721_s22 }
0x102b   : > { %p31_p3 = scmp.ge.s32.totalorder %s34_s26, 4   ;;  %s3478_s22 = smov %s2725_s23 }
0x102c   : > { %s3479_s23 = smov %s3025_s18  ;;  %s3480_s24 = smov %s2733_s25 }
0x102d   : > { %s3481_s25 = smov %s3483_s1  ;;  %33 = sbr.rel (!%p31_p3) target bundleno = 21 (0x15), region = 171 }
0x1034   :  { %1966 = vsyncpa [#allocation6], 1 }
0x1035   :  { %1968 = vsyncpa [#allocation6 + $0x1], 1 }
0x1036   :  { %1969 = vsyncpa [#allocation9], 1 }
0x1037   :  { %1970 = vsyncpa [#allocation12], 1 }
0x1038   :  { %1971 = vsyncpa [#allocation7], 1 }
0x1039   :  { %1973 = vsyncpa [#allocation7 + $0x1], 1 }

</bundles_post_ra>
